<compile_context>
chip_gen: v6e
topology: v6e:2x2x1
jax: 0.10.0
libtpu: 0.0.40
codegen_flags: <defaults>
</compile_context>

<pallas_src>
import jax
import jax.numpy as jnp
from jax import lax
from jax.experimental import pallas as pl
from jax.experimental.pallas import tpu as pltpu


# -----------------------------------------------------------------------------
# Fused forward kernel: one grid step per batch image.
#   conv_t (Cout, HW)        = wc (Cout, C*9) @ patches_T (C*9, HW) + b_conv
#   pw     (Cout, Cout*BLK)  = conv_t @ wfc_wide (HW, Cout*BLK)
#   logits (1, Ncls)         = b_fc + sum_c pw[c, c*BLK : c*BLK + Ncls]
# -----------------------------------------------------------------------------
def fused_forward_kernel(p_ref, wc_ref, bc_ref, wfc_ref, bfc_ref, o_ref):
    c_out = wc_ref.shape[0]            # 16
    n_cls = bfc_ref.shape[1]           # 10
    blk = wfc_ref.shape[1] // c_out    # 16 (per-channel lane block, padded)

    # conv1 as one MXU matmul, channel-major output -> lane-dense (HW lanes).
    conv_t = jnp.dot(wc_ref[...], p_ref[...],
                     preferred_element_type=jnp.float32) + bc_ref[...]

    # fc1: contract over HW with one wide matmul; each channel's weight slab
    # occupies its own 16-lane block of the 256-wide RHS.
    pw = jnp.dot(conv_t, wfc_ref[...], preferred_element_type=jnp.float32)

    # Sum the block diagonal (= sum over channels of per-channel dot products).
    # 16 static slice-adds of a (1, n_cls) row — negligible next to the matmuls.
    fc = bfc_ref[...] + pw[0:1, 0:n_cls]
    for c in range(1, c_out):
        fc = fc + pw[c:c + 1, c * blk:c * blk + n_cls]

    o_ref[...] = fc.reshape(1, 1, n_cls)


# -----------------------------------------------------------------------------
# Wrapper-side glue
# -----------------------------------------------------------------------------
def im2col_transposed(x):
    """x: (B, C, H, W) -> (C*9, B*H*W).  Rows ordered (c, kh, kw) to match
    PyTorch's OIHW weight flatten; columns ordered (b, h, w)."""
    B, C, H, W = x.shape
    xp = jnp.pad(x, ((0, 0), (0, 0), (1, 1), (1, 1)))
    shifts = [xp[:, :, i:i + H, j:j + W] for i in range(3) for j in range(3)]
    p = jnp.stack(shifts, axis=2)          # (B, C, 9, H, W)
    p = p.transpose(1, 2, 0, 3, 4)         # (C, 9, B, H, W)
    return p.reshape(C * 9, B * H * W)


def prepare_params(params, blk=16):
    """One-time weight re-layout (outside the forward / hot path)."""
    w_conv, b_conv = params["w_conv"], params["b_conv"]
    w_fc, b_fc = params["w_fc"], params["b_fc"]
    c_out = w_conv.shape[0]                      # 16
    n_cls = w_fc.shape[0]                        # 10
    hw = w_fc.shape[1] // c_out                  # 1024
    assert n_cls <= blk

    wc_mat = w_conv.reshape(c_out, -1)           # (16, 27), (c, kh, kw) order
    b_conv_col = b_conv.reshape(c_out, 1)        # broadcast along lanes

    # w_fc[n, c*hw + p] -> wfc_wide[p, c*blk + n]  (padded to blk lanes/channel)
    w4 = w_fc.reshape(n_cls, c_out, hw).transpose(2, 1, 0)       # (hw, c, n)
    w4 = jnp.pad(w4, ((0, 0), (0, 0), (0, blk - n_cls)))         # (hw, c, blk)
    wfc_wide = w4.reshape(hw, c_out * blk)                       # (1024, 256)

    b_fc_row = b_fc.reshape(1, n_cls)
    return {"wc_mat": wc_mat, "b_conv_col": b_conv_col,
            "wfc_wide": wfc_wide, "b_fc_row": b_fc_row}


def simple_model_forward(x, prepped):
    """x: (B, 3, 32, 32) f32 -> (B, 10) f32, matching PyTorch SimpleModel."""
    B, C, H, W = x.shape
    HW = H * W
    n_cls = prepped["b_fc_row"].shape[1]

    patches_t = im2col_transposed(x)             # (C*9, B*HW)

    out3 = pl.pallas_call(
        fused_forward_kernel,
        out_shape=jax.ShapeDtypeStruct((B, 1, n_cls), jnp.float32),
        grid=(B,),   # one step per image; parallel steps feed both v7x TCs
        in_specs=[
            pl.BlockSpec((C * 9, HW), lambda b: (0, b)),            # patches
            pl.BlockSpec(prepped["wc_mat"].shape, lambda b: (0, 0)),
            pl.BlockSpec(prepped["b_conv_col"].shape, lambda b: (0, 0)),
            pl.BlockSpec(prepped["wfc_wide"].shape, lambda b: (0, 0)),
            pl.BlockSpec(prepped["b_fc_row"].shape, lambda b: (0, 0)),
        ],
        out_specs=pl.BlockSpec((1, 1, n_cls), lambda b: (b, 0, 0)),
        compiler_params=pltpu.CompilerParams(
            dimension_semantics=("parallel",)),
    )(patches_t, prepped["wc_mat"], prepped["b_conv_col"],
      prepped["wfc_wide"], prepped["b_fc_row"])

    return out3.reshape(B, n_cls)


# -----------------------------------------------------------------------------
# Reference / setup
# -----------------------------------------------------------------------------
def init_params(key):
    k1, k2, k3, k4 = jax.random.split(key, 4)
    w_conv = jax.random.normal(k1, (16, 3, 3, 3), jnp.float32) * 0.1
    b_conv = jax.random.normal(k2, (16,), jnp.float32) * 0.1
    w_fc = jax.random.normal(k3, (10, 16 * 32 * 32), jnp.float32) * 0.01
    b_fc = jax.random.normal(k4, (10,), jnp.float32) * 0.1
    return {"w_conv": w_conv, "b_conv": b_conv, "w_fc": w_fc, "b_fc": b_fc}


def reference_forward(x, params):
    conv = lax.conv_general_dilated(
        x, params["w_conv"], window_strides=(1, 1), padding=((1, 1), (1, 1)),
        dimension_numbers=("NCHW", "OIHW", "NCHW"),
    ) + params["b_conv"][None, :, None, None]
    flat = conv.reshape(x.shape[0], -1)
    return flat @ params["w_fc"].T + params["b_fc"]


if __name__ == "__main__":
    key = jax.random.PRNGKey(0)
    kx, kp = jax.random.split(key)

    # Spatial size must be 32 so Linear(16*32*32, 10) shapes are consistent.
    x = jax.random.normal(kx, (2, 3, 32, 32), jnp.float32)
    params = init_params(kp)
    prepped = prepare_params(params)       # one-time weight re-layout

    fwd = jax.jit(simple_model_forward)
    out = jax.block_until_ready(fwd(x, prepped))
    ref = jax.block_until_ready(reference_forward(x, params))

    assert out.shape == (2, 10), out.shape
    assert jnp.allclose(out, ref, atol=1e-3, rtol=1e-3), "mismatch vs reference"

    print("KERNEL_OK")
</pallas_src>

<mosaic_0001>
module attributes {stable_mosaic.version = 11 : i64} {
  func.func @fused_forward_kernel(%arg0: i32, %arg1: memref<27x1024xf32, #tpu.memory_space<vmem>>, %arg2: memref<16x27xf32, #tpu.memory_space<vmem>>, %arg3: memref<16x1xf32, #tpu.memory_space<vmem>>, %arg4: memref<1024x256xf32, #tpu.memory_space<vmem>>, %arg5: memref<1x10xf32, #tpu.memory_space<vmem>>, %arg6: memref<1x1x10xf32, #tpu.memory_space<vmem>>) attributes {dimension_semantics = [#tpu.dimension_semantics<parallel>], iteration_bounds = array<i64: 2>, scalar_prefetch = 0 : i64, scratch_operands = 0 : i64, tpu.core_type = #tpu.core_type<tc>, window_params = [{transform_indices = @transform_0, window_bounds = array<i64: 27, 1024>}, {pipeline_mode = #tpu.pipeline_mode<synchronous>, transform_indices = @transform_1, window_bounds = array<i64: 16, 27>}, {pipeline_mode = #tpu.pipeline_mode<synchronous>, transform_indices = @transform_2, window_bounds = array<i64: 16, 1>}, {pipeline_mode = #tpu.pipeline_mode<synchronous>, transform_indices = @transform_3, window_bounds = array<i64: 1024, 256>}, {pipeline_mode = #tpu.pipeline_mode<synchronous>, transform_indices = @transform_4, window_bounds = array<i64: 1, 10>}, {transform_indices = @transform_5, window_bounds = array<i64: 1, 1, 10>}]} {
    %c0 = arith.constant 0 : index
    %c0_0 = arith.constant 0 : index
    %0 = vector.load %arg2[%c0, %c0_0] : memref<16x27xf32, #tpu.memory_space<vmem>>, vector<16x27xf32>
    %c0_1 = arith.constant 0 : index
    %c0_2 = arith.constant 0 : index
    %1 = vector.load %arg1[%c0_1, %c0_2] : memref<27x1024xf32, #tpu.memory_space<vmem>>, vector<27x1024xf32>
    %cst = arith.constant dense<0.000000e+00> : vector<16x1024xf32>
    %2 = tpu.matmul %0, %1, %cst {dimension_numbers = #tpu.dot_dimension_numbers<[1], [0], [0], [1], [0, 0, 1, 1], [], []>} : vector<16x27xf32>, vector<27x1024xf32>, vector<16x1024xf32> -> vector<16x1024xf32>
    %c0_3 = arith.constant 0 : index
    %c0_4 = arith.constant 0 : index
    %3 = vector.load %arg3[%c0_3, %c0_4] : memref<16x1xf32, #tpu.memory_space<vmem>>, vector<16x1xf32>
    %4 = vector.broadcast %3 : vector<16x1xf32> to vector<16x1024xf32>
    %5 = arith.addf %2, %4 : vector<16x1024xf32>
    %c0_5 = arith.constant 0 : index
    %c0_6 = arith.constant 0 : index
    %6 = vector.load %arg4[%c0_5, %c0_6] : memref<1024x256xf32, #tpu.memory_space<vmem>>, vector<1024x256xf32>
    %cst_7 = arith.constant dense<0.000000e+00> : vector<16x256xf32>
    %7 = tpu.matmul %5, %6, %cst_7 {dimension_numbers = #tpu.dot_dimension_numbers<[1], [0], [0], [1], [0, 0, 1, 1], [], []>} : vector<16x1024xf32>, vector<1024x256xf32>, vector<16x256xf32> -> vector<16x256xf32>
    %c0_8 = arith.constant 0 : index
    %c0_9 = arith.constant 0 : index
    %8 = vector.load %arg5[%c0_8, %c0_9] : memref<1x10xf32, #tpu.memory_space<vmem>>, vector<1x10xf32>
    %9 = vector.extract_strided_slice %7 {offsets = [0, 0], sizes = [1, 10], strides = [1, 1]} : vector<16x256xf32> to vector<1x10xf32>
    %10 = arith.addf %8, %9 : vector<1x10xf32>
    %11 = vector.extract_strided_slice %7 {offsets = [1, 16], sizes = [1, 10], strides = [1, 1]} : vector<16x256xf32> to vector<1x10xf32>
    %12 = arith.addf %10, %11 : vector<1x10xf32>
    %13 = vector.extract_strided_slice %7 {offsets = [2, 32], sizes = [1, 10], strides = [1, 1]} : vector<16x256xf32> to vector<1x10xf32>
    %14 = arith.addf %12, %13 : vector<1x10xf32>
    %15 = vector.extract_strided_slice %7 {offsets = [3, 48], sizes = [1, 10], strides = [1, 1]} : vector<16x256xf32> to vector<1x10xf32>
    %16 = arith.addf %14, %15 : vector<1x10xf32>
    %17 = vector.extract_strided_slice %7 {offsets = [4, 64], sizes = [1, 10], strides = [1, 1]} : vector<16x256xf32> to vector<1x10xf32>
    %18 = arith.addf %16, %17 : vector<1x10xf32>
    %19 = vector.extract_strided_slice %7 {offsets = [5, 80], sizes = [1, 10], strides = [1, 1]} : vector<16x256xf32> to vector<1x10xf32>
    %20 = arith.addf %18, %19 : vector<1x10xf32>
    %21 = vector.extract_strided_slice %7 {offsets = [6, 96], sizes = [1, 10], strides = [1, 1]} : vector<16x256xf32> to vector<1x10xf32>
    %22 = arith.addf %20, %21 : vector<1x10xf32>
    %23 = vector.extract_strided_slice %7 {offsets = [7, 112], sizes = [1, 10], strides = [1, 1]} : vector<16x256xf32> to vector<1x10xf32>
    %24 = arith.addf %22, %23 : vector<1x10xf32>
    %25 = vector.extract_strided_slice %7 {offsets = [8, 128], sizes = [1, 10], strides = [1, 1]} : vector<16x256xf32> to vector<1x10xf32>
    %26 = arith.addf %24, %25 : vector<1x10xf32>
    %27 = vector.extract_strided_slice %7 {offsets = [9, 144], sizes = [1, 10], strides = [1, 1]} : vector<16x256xf32> to vector<1x10xf32>
    %28 = arith.addf %26, %27 : vector<1x10xf32>
    %29 = vector.extract_strided_slice %7 {offsets = [10, 160], sizes = [1, 10], strides = [1, 1]} : vector<16x256xf32> to vector<1x10xf32>
    %30 = arith.addf %28, %29 : vector<1x10xf32>
    %31 = vector.extract_strided_slice %7 {offsets = [11, 176], sizes = [1, 10], strides = [1, 1]} : vector<16x256xf32> to vector<1x10xf32>
    %32 = arith.addf %30, %31 : vector<1x10xf32>
    %33 = vector.extract_strided_slice %7 {offsets = [12, 192], sizes = [1, 10], strides = [1, 1]} : vector<16x256xf32> to vector<1x10xf32>
    %34 = arith.addf %32, %33 : vector<1x10xf32>
    %35 = vector.extract_strided_slice %7 {offsets = [13, 208], sizes = [1, 10], strides = [1, 1]} : vector<16x256xf32> to vector<1x10xf32>
    %36 = arith.addf %34, %35 : vector<1x10xf32>
    %37 = vector.extract_strided_slice %7 {offsets = [14, 224], sizes = [1, 10], strides = [1, 1]} : vector<16x256xf32> to vector<1x10xf32>
    %38 = arith.addf %36, %37 : vector<1x10xf32>
    %39 = vector.extract_strided_slice %7 {offsets = [15, 240], sizes = [1, 10], strides = [1, 1]} : vector<16x256xf32> to vector<1x10xf32>
    %40 = arith.addf %38, %39 : vector<1x10xf32>
    %41 = vector.shape_cast %40 : vector<1x10xf32> to vector<1x1x10xf32>
    %c0_10 = arith.constant 0 : index
    %c0_11 = arith.constant 0 : index
    %c0_12 = arith.constant 0 : index
    %42 = vector.load %arg6[%c0_10, %c0_11, %c0_12] : memref<1x1x10xf32, #tpu.memory_space<vmem>>, vector<1x1x10xf32>
    tpu.vector_store %arg6[%c0_10, %c0_11, %c0_12], %41 {strides = array<i32>} : memref<1x1x10xf32, #tpu.memory_space<vmem>>, vector<1x1x10xf32>,
    return
  }
  func.func @transform_0(%arg0: i32) -> (i32, i32) {
    %c0_i32 = arith.constant 0 : i32
    %c0_i32_0 = arith.constant 0 : i32
    return %c0_i32, %arg0 : i32, i32
  }
  func.func @transform_1(%arg0: i32) -> (i32, i32) {
    %c0_i32 = arith.constant 0 : i32
    %c0_i32_0 = arith.constant 0 : i32
    %c0_i32_1 = arith.constant 0 : i32
    return %c0_i32, %c0_i32_0 : i32, i32
  }
  func.func @transform_2(%arg0: i32) -> (i32, i32) {
    %c0_i32 = arith.constant 0 : i32
    %c0_i32_0 = arith.constant 0 : i32
    %c0_i32_1 = arith.constant 0 : i32
    return %c0_i32, %c0_i32_0 : i32, i32
  }
  func.func @transform_3(%arg0: i32) -> (i32, i32) {
    %c0_i32 = arith.constant 0 : i32
    %c0_i32_0 = arith.constant 0 : i32
    %c0_i32_1 = arith.constant 0 : i32
    return %c0_i32, %c0_i32_0 : i32, i32
  }
  func.func @transform_4(%arg0: i32) -> (i32, i32) {
    %c0_i32 = arith.constant 0 : i32
    %c0_i32_0 = arith.constant 0 : i32
    %c0_i32_1 = arith.constant 0 : i32
    return %c0_i32, %c0_i32_0 : i32, i32
  }
  func.func @transform_5(%arg0: i32) -> (i32, i32, i32) {
    %c0_i32 = arith.constant 0 : i32
    %c0_i32_0 = arith.constant 0 : i32
    %c0_i32_1 = arith.constant 0 : i32
    return %arg0, %c0_i32, %c0_i32_0 : i32, i32, i32
  }
}

</mosaic_0001>

<bundles_post_ra>
// kernel: simple_model_forward.1
= control target key start
LH: loop header
LB: loop body
LE: loop exit
PB: predicated region body
PF: predicated region fallthrough
CT: control target
= control target key end

     0   :  { %10 = vsyncpa [#allocation4], 0  ;;  %s2695_s0 = inlined_call_operand.vmem [shape: f32[27,2048], index: 0, kind: input, shape index: {}]   ;;  %s2696_s1 = inlined_call_operand.vmem [shape: f32[16,27], index: 1, kind: input, shape index: {}]   ;;  %s2697_s2 = inlined_call_operand.vmem [shape: f32[16,1], index: 2, kind: input, shape index: {}]   ;;  %s2698_s3 = inlined_call_operand.vmem [shape: f32[1024,256], index: 3, kind: input, shape index: {}]   ;;  %s2699_s4 = inlined_call_operand.vmem [shape: f32[1,10], index: 4, kind: input, shape index: {}]   ;;  %s2700_s5 = inlined_call_operand.hbm [shape: f32[2,1,10], index: 5, kind: output, shape index: {}]  }
   0x1   :  { %12 = vsyncpa [#allocation4 + $0x1], 0  ;;  %s1663_s18 = smov 0   ;;  %s1665_s19 = smov 0  }
   0x2   :  { %s1667_s20 = smov 0   ;;  %s1669_s21 = smov 0  }
   0x3 LB: > { %s1481_s22 = sadd.s32 4294967295, %s1620_s21   ;;  %s1482_s23 = sadd.s32 4294967294, %s1620_s21   ;;  %s1620_s21 = sphi %s1669_s21, %s2708_s21   ;;  %s1616_s20 = sphi %s1667_s20, %s2707_s20   ;;  %s1612_s19 = sphi %s1665_s19, %s2706_s19   ;;  %s1608_s18 = sphi %s1663_s18, %s2705_s18  }
   0x4   : > { %s1686_s24 = sadd.s32 1, %s1620_s21   ;;  %s25_s25 = sadd.s32 1, %s1616_s20 }
   0x5   : > { %s22_s26 = ssub.s32 %s1620_s21, %s1686_s24  ;;  %p32_p0 = scmp.ne.s32.totalorder %s1616_s20, %s1612_s19 }
   0x6   : > { %p23_p1 = scmp.eq.s32.totalorder %s22_s26, 0  ;;  %p33_p2 = scmp.eq.s32.totalorder %s1620_s21, 0 }
   0x7   : > { %p146_p3 = scmp.eq.s32.totalorder %s1481_s22, 1  ;;  %p151_p4 = scmp.ne.s32.totalorder %s1612_s19, %s1608_s18 }
   0x8   : > { %s1699_s27 = scalar_select %p23_p1, %s1616_s20, %s25_s25  }
   0x9   : > { %p34_p5 = por %p33_p2, %p32_p0  ;;  %p1701_p6 = por %p146_p3, %p32_p0 }
   0xa   : > { %p152_p7 = scmp.eq.s32.totalorder %s1482_s23, 1  ;;  %p2701_p9 = scmp.ge.s32.totalorder %s1620_s21, 2 }
   0xc   : > { %p1705_p8 = por %p152_p7, %p151_p4  ;;  %180 = sbr.rel (%p2701_p9) target bundleno = 37 (0x25), region = 32 }
  0x11   : > { %183 = sbr.rel (!%p34_p5) target bundleno = 37 (0x25), region = 36  ;;  %s185_s30 = sand.u32 (%p34_p5), 1, %s1616_s20  }
  0x12   : > { %s1509_s6 = sshll.u32 (%p34_p5), %s1620_s21, 6  ;;  %s1485_s7 = sshll.u32 (%p34_p5), %s185_s30, 8 }
  0x13   : > { %s1717_s10 = scalar_lea.vmem (%p34_p5), %s2695_s0, %s1509_s6  ;;  %s1722_s11 = scalar_lea.vmem (%p34_p5), [#allocation2], %s1485_s7 }
  0x14   : > { %v203_v0 = vld [vmem:[%s1717_s10] sm:$0xff] (%p34_p5)  ;;  %v205_v1 = vld [vmem:[%s1717_s10 + $0x8] sm:$0xff] (%p34_p5)  ;;  %v207_v2 = vld [vmem:[%s1717_s10 + $0x10] sm:$0xff] (%p34_p5) }
  0x15   : > { %204 = vst [vmem:[%s1722_s11] sm:$0xff] (%p34_p5), %v203_v0  ;;  %206 = vst [vmem:[%s1722_s11 + $0x8] sm:$0xff] (%p34_p5), %v205_v1  ;;  %v209_v3 = vld [vmem:[%s1717_s10 + $0x18] sm:$0xff] (%p34_p5)  ;;  %v211_v4 = vld [vmem:[%s1717_s10 + $0x20] sm:$0xff] (%p34_p5) }
  0x16   : > { %208 = vst [vmem:[%s1722_s11 + $0x10] sm:$0xff] %v207_v2  ;;  %v213_v5 = vld [vmem:[%s1717_s10 + $0x28] sm:$0xff]  ;;  %210 = vst [vmem:[%s1722_s11 + $0x18] sm:$0xff] %v209_v3  ;;  %v215_v6 = vld [vmem:[%s1717_s10 + $0x30] sm:$0xff] }
  0x17   : > { %212 = vst [vmem:[%s1722_s11 + $0x20] sm:$0xff] %v211_v4  ;;  %214 = vst [vmem:[%s1722_s11 + $0x28] sm:$0xff] %v213_v5  ;;  %v217_v7 = vld [vmem:[%s1717_s10 + $0x38] sm:$0xff]  ;;  %v219_v8 = vld [vmem:[%s1717_s10 + $0x80] sm:$0xff] }
  0x18   : > { %216 = vst [vmem:[%s1722_s11 + $0x30] sm:$0xff] %v215_v6  ;;  %218 = vst [vmem:[%s1722_s11 + $0x38] sm:$0xff] %v217_v7  ;;  %v221_v9 = vld [vmem:[%s1717_s10 + $0x88] sm:$0xff]  ;;  %v223_v10 = vld [vmem:[%s1717_s10 + $0x90] sm:$0xff] }
  0x19   : > { %220 = vst [vmem:[%s1722_s11 + $0x40] sm:$0xff] %v219_v8  ;;  %v225_v11 = vld [vmem:[%s1717_s10 + $0x98] sm:$0xff]  ;;  %222 = vst [vmem:[%s1722_s11 + $0x48] sm:$0xff] %v221_v9  ;;  %v227_v12 = vld [vmem:[%s1717_s10 + $0xa0] sm:$0xff] }
  0x1a   : > { %224 = vst [vmem:[%s1722_s11 + $0x50] sm:$0xff] %v223_v10  ;;  %226 = vst [vmem:[%s1722_s11 + $0x58] sm:$0xff] %v225_v11  ;;  %v229_v13 = vld [vmem:[%s1717_s10 + $0xa8] sm:$0xff]  ;;  %v231_v14 = vld [vmem:[%s1717_s10 + $0xb0] sm:$0xff] }
  0x1b   : > { %228 = vst [vmem:[%s1722_s11 + $0x60] sm:$0xff] %v227_v12  ;;  %230 = vst [vmem:[%s1722_s11 + $0x68] sm:$0xff] %v229_v13  ;;  %v233_v15 = vld [vmem:[%s1717_s10 + $0xb8] sm:$0xff]  ;;  %v235_v16 = vld [vmem:[%s1717_s10 + $0x100] sm:$0xff] }
  0x1c   : > { %232 = vst [vmem:[%s1722_s11 + $0x70] sm:$0xff] %v231_v14  ;;  %v237_v17 = vld [vmem:[%s1717_s10 + $0x108] sm:$0xff]  ;;  %234 = vst [vmem:[%s1722_s11 + $0x78] sm:$0xff] %v233_v15  ;;  %v239_v18 = vld [vmem:[%s1717_s10 + $0x110] sm:$0xff] }
  0x1d   : > { %236 = vst [vmem:[%s1722_s11 + $0x80] sm:$0xff] %v235_v16  ;;  %238 = vst [vmem:[%s1722_s11 + $0x88] sm:$0xff] %v237_v17  ;;  %v241_v19 = vld [vmem:[%s1717_s10 + $0x118] sm:$0xff]  ;;  %v243_v20 = vld [vmem:[%s1717_s10 + $0x120] sm:$0xff] }
  0x1e   : > { %240 = vst [vmem:[%s1722_s11 + $0x90] sm:$0xff] %v239_v18  ;;  %242 = vst [vmem:[%s1722_s11 + $0x98] sm:$0xff] %v241_v19  ;;  %v245_v21 = vld [vmem:[%s1717_s10 + $0x128] sm:$0xff]  ;;  %v247_v22 = vld [vmem:[%s1717_s10 + $0x130] sm:$0xff] }
  0x1f   : > { %244 = vst [vmem:[%s1722_s11 + $0xa0] sm:$0xff] %v243_v20  ;;  %v249_v23 = vld [vmem:[%s1717_s10 + $0x138] sm:$0xff]  ;;  %246 = vst [vmem:[%s1722_s11 + $0xa8] sm:$0xff] %v245_v21  ;;  %v251_v24 = vld [vmem:[%s1717_s10 + $0x180] sm:$0xff] }
  0x20   : > { %248 = vst [vmem:[%s1722_s11 + $0xb0] sm:$0xff] %v247_v22  ;;  %250 = vst [vmem:[%s1722_s11 + $0xb8] sm:$0xff] %v249_v23  ;;  %v253_v25 = vld [vmem:[%s1717_s10 + $0x188] sm:$0xff]  ;;  %v255_v26 = vld [vmem:[%s1717_s10 + $0x190] sm:$0xff] }
  0x21   : > { %252 = vst [vmem:[%s1722_s11 + $0xc0] sm:$0xff] %v251_v24  ;;  %254 = vst [vmem:[%s1722_s11 + $0xc8] sm:$0xff] %v253_v25  ;;  %v257_v27 = vld [vmem:[%s1717_s10 + $0x198] sm:$0xff]  ;;  %v259_v28 = vld [vmem:[%s1717_s10 + $0x1a0] sm:$0xff] }
  0x22   : > { %256 = vst [vmem:[%s1722_s11 + $0xd0] sm:$0xff] %v255_v26  ;;  %v261_v29 = vld [vmem:[%s1717_s10 + $0x1a8] sm:$0xff]  ;;  %258 = vst [vmem:[%s1722_s11 + $0xd8] sm:$0xff] %v257_v27  ;;  %v263_v30 = vld [vmem:[%s1717_s10 + $0x1b0] sm:$0xff] }
  0x23   : > { %260 = vst [vmem:[%s1722_s11 + $0xe0] sm:$0xff] %v259_v28  ;;  %262 = vst [vmem:[%s1722_s11 + $0xe8] sm:$0xff] %v261_v29  ;;  %v265_v31 = vld [vmem:[%s1717_s10 + $0x1b8] sm:$0xff] }
  0x24   : > { %264 = vst [vmem:[%s1722_s11 + $0xf0] sm:$0xff] %v263_v30  ;;  %266 = vst [vmem:[%s1722_s11 + $0xf8] sm:$0xff] %v265_v31 }
  0x25 PF: > { %p1488_p10 = scmp.ge.s32.totalorder %s1620_s21, 1  ;;  %p271_p11 = scmp.lt.s32.totalorder %s1620_s21, 3 }
  0x27   : > { %p272_p12 = pnand %p1488_p10, %p271_p11 }
  0x28   : > { %s1788_s12 = sand.u32 (!%p272_p12), 1, %s1612_s19   ;;  %s1625_s9 = smov (!%p272_p12), 112  }
  0x29   : > { %275 = sbr.rel (%p272_p12) target bundleno = 685 (0x2ad), region = 59  ;;  %s1489_s13 = sshll.u32 (!%p272_p12), %s1788_s12, 8 }
  0x2a   : > { %s1796_s16 = scalar_lea.vmem (!%p272_p12), [#allocation2], %s1489_s13  ;;  %s1626_s10 = smov (!%p272_p12), 80  }
  0x2b   : > { %s1627_s11 = smov (!%p272_p12), 96   ;;  %s1628_s13 = smov (!%p272_p12), 48  }
  0x2c   : > { %s1629_s14 = smov (!%p272_p12), 64   ;;  %s1630_s15 = smov (!%p272_p12), 16  }
  0x2d   : > { %s1506_s25 = sshll.u32 (!%p272_p12), %s1481_s22, 4  ;;  %s303_s26 = scalar_lea.vmem (!%p272_p12), [#allocation3], %s1788_s12 }
  0x2e   : > { %vm358_vm0 = vcmask 1042432   ;;  %v1622_v32 = vmov 0.0   ;;  %v339_v33 = vld [vmem:[%s2697_s2] sm:$0xff]  ;;  %v1623_v34 = vmov 0   ;;  %v332_v35 = vld [vmem:[%s1796_s16 + $0xc8] sm:$0x7]  ;;  %s1419_s8 = scalar_lea.hbm %s2700_s5, %s1506_s25 }
  0x2f   : > { %447 = vmatprep.mubr.f32.mxu0 %v1622_v32  ;;  %524 = vmatprep.mubr.f32.mxu1 %v1622_v32  ;;  %v334_v36 = vld [vmem:[%s1796_s16 + $0xd8] sm:$0x7]  ;;  %v331_v37 = vld [vmem:[%s1796_s16 + $0xc0] sm:$0x7]  ;;  %v333_v38 = vld [vmem:[%s1796_s16 + $0xd0] sm:$0x7] }
  0x30   : > { %1559 = vset.pattern.permute.xlu0 %v1623_v34  ;;  %1490 = vmatprep.subr.msk.mxu0 %vm358_vm0, %v332_v35  ;;  %v324_v39 = vld [vmem:[%s1796_s16 + $0x88] sm:$0xff]  ;;  %v326_v40 = vld [vmem:[%s1796_s16 + $0x98] sm:$0xff]  ;;  %v323_v41 = vld [vmem:[%s1796_s16 + $0x80] sm:$0xff]  ;;  %vm351_vm1 = vcmask 220160   ;;  %s1421_s30 = sshll.u32 %s303_s26, 4  ;;  %vm1406_vm2 = vcmask 73728   ;;  %s1422_s30 = int_to_ptr.vmem [resolvable:$true] %s1421_s30 }
  0x31   : > { %343 = vperm.xlu0 %1559, %v339_v33   ;;  %1494 = vmatprep.subr.msk.mxu1 %vm358_vm0, %v334_v36  ;;  %v325_v42 = vld [vmem:[%s1796_s16 + $0x90] sm:$0xff]  ;;  %v316_v43 = vld [vmem:[%s1796_s16 + $0x48] sm:$0xff]  ;;  %v318_v44 = vld [vmem:[%s1796_s16 + $0x58] sm:$0xff] }
  0x32   : > { %1491 = vmatpush1.msk.msra.mxu0 %vm358_vm0, %v331_v37  ;;  %1495 = vmatpush1.msk.msra.mxu1 %vm358_vm0, %v333_v38  ;;  %v315_v45 = vld [vmem:[%s1796_s16 + $0x40] sm:$0xff]  ;;  %v317_v46 = vld [vmem:[%s1796_s16 + $0x50] sm:$0xff]  ;;  %v308_v47 = vld [vmem:[%s1796_s16 + $0x8] sm:$0xff] }
  0x33   : > { %409 = vmatprep.subr.mxu0 %v324_v39  ;;  %486 = vmatprep.subr.mxu1 %v326_v40  ;;  %v310_v48 = vld [vmem:[%s1796_s16 + $0x18] sm:$0xff]  ;;  %v307_v49 = vld [vmem:[%s1796_s16] sm:$0xff]  ;;  %v309_v50 = vld [vmem:[%s1796_s16 + $0x10] sm:$0xff] }
  0x34   : > { %410 = vmatpush1.msra.mxu0 %v323_v41  ;;  %487 = vmatpush1.msra.mxu1 %v325_v42  ;;  %v305_v51 = vld [vmem:[%s2696_s1] sm:$0xff]  ;;  %v336_v52 = vld [vmem:[%s1796_s16 + $0xe8] sm:$0x7]  ;;  %v338_v53 = vld [vmem:[%s1796_s16 + $0xf8] sm:$0x7] }
  0x35   : > { %411 = vmatprep.subr.mxu0 %v316_v43  ;;  %488 = vmatprep.subr.mxu1 %v318_v44  ;;  %v335_v54 = vld [vmem:[%s1796_s16 + $0xe0] sm:$0x7]  ;;  %v337_v55 = vld [vmem:[%s1796_s16 + $0xf0] sm:$0x7]  ;;  %v328_v56 = vld [vmem:[%s1796_s16 + $0xa8] sm:$0xff] }
  0x36   : > { %412 = vmatpush1.msra.mxu0 %v315_v45  ;;  %489 = vmatpush1.msra.mxu1 %v317_v46  ;;  %v330_v57 = vld [vmem:[%s1796_s16 + $0xb8] sm:$0xff]  ;;  %v327_v58 = vld [vmem:[%s1796_s16 + $0xa0] sm:$0xff]  ;;  %v329_v59 = vld [vmem:[%s1796_s16 + $0xb0] sm:$0xff] }
  0x37   : > { %413 = vmatprep.subr.mxu0 %v308_v47  ;;  %490 = vmatprep.subr.mxu1 %v310_v48  ;;  %v306_v60 = vld [vmem:[%s2696_s1 + $0x8] sm:$0xff]  ;;  %v322_v62 = vld [vmem:[%s1796_s16 + $0x78] sm:$0xff]  ;;  %v319_v63 = vld [vmem:[%s1796_s16 + $0x60] sm:$0xff] }
  0x38   : > { %414 = vmatpush1.msra.mxu0 %v307_v49  ;;  %491 = vmatpush1.msra.mxu1 %v309_v50  ;;  %v320_v61 = vld [vmem:[%s1796_s16 + $0x68] sm:$0xff]  ;;  %v321_v0 = vld [vmem:[%s1796_s16 + $0x70] sm:$0xff]  ;;  %v314_v2 = vld [vmem:[%s1796_s16 + $0x38] sm:$0xff] }
  0x39   : > { %1492 = vmatmul.mubr.msk.f32.vlgmr.msra.gmra.mxu0 %vm351_vm1, %v305_v51  ;;  %1496 = vmatmul.mubr.msk.f32.vlgmr.msra.gmra.mxu1 %vm351_vm1, %v305_v51  ;;  %v312_v1 = vld [vmem:[%s1796_s16 + $0x28] sm:$0xff]  ;;  %v311_v3 = vld [vmem:[%s1796_s16 + $0x20] sm:$0xff]  ;;  %v313_v4 = vld [vmem:[%s1796_s16 + $0x30] sm:$0xff]  ;;  %s1631_s16 = smov 32  }
  0x3a   : > { %1498 = vmatprep.subr.msk.mxu0 %vm358_vm0, %v336_v52  ;;  %1502 = vmatprep.subr.msk.mxu1 %vm358_vm0, %v338_v53  ;;  %v340_v5 = vld [vmem:[%s2697_s2 + $0x8] sm:$0xff]  ;;  %v722_v6 = vld [vmem:[%s2698_s3 + $0xf8] sm:$0xff]  ;;  %v721_v8 = vld [vmem:[%s2698_s3 + $0xf0] sm:$0xff] }
  0x3b   : > { %1499 = vmatpush1.msk.msra.mxu0 %vm358_vm0, %v335_v54  ;;  %1503 = vmatpush1.msk.msra.mxu1 %vm358_vm0, %v337_v55  ;;  %v786_v7 = vld [vmem:[%s2698_s3 + $0x2f8] sm:$0xff]  ;;  %v785_v9 = vld [vmem:[%s2698_s3 + $0x2f0] sm:$0xff]  ;;  %v720_v10 = vld [vmem:[%s2698_s3 + $0xe8] sm:$0xff] }
  0x3c   : > { %563 = vmatprep.subr.mxu0 %v328_v56  ;;  %640 = vmatprep.subr.mxu1 %v330_v57  ;;  %v784_v11 = vld [vmem:[%s2698_s3 + $0x2e8] sm:$0xff]  ;;  %v719_v12 = vld [vmem:[%s2698_s3 + $0xe0] sm:$0xff]  ;;  %v718_v14 = vld [vmem:[%s2698_s3 + $0xd8] sm:$0xff] }
  0x3d   : > { %453 = vmatprep.mubr.f32.mxu0 %v1622_v32  ;;  %530 = vmatprep.mubr.f32.mxu1 %v1622_v32  ;;  %v783_v13 = vld [vmem:[%s2698_s3 + $0x2e0] sm:$0xff]  ;;  %v782_v15 = vld [vmem:[%s2698_s3 + $0x2d8] sm:$0xff]  ;;  %v717_v16 = vld [vmem:[%s2698_s3 + $0xd0] sm:$0xff] }
  0x3e   : > { %564 = vmatpush1.msra.mxu0 %v327_v58  ;;  %641 = vmatpush1.msra.mxu1 %v329_v59  ;;  %v781_v17 = vld [vmem:[%s2698_s3 + $0x2d0] sm:$0xff]  ;;  %v716_v18 = vld [vmem:[%s2698_s3 + $0xc8] sm:$0xff]  ;;  %v715_v20 = vld [vmem:[%s2698_s3 + $0xc0] sm:$0xff] }
  0x3f   : > { %1493 = vmatmul.mubr.msk.f32.gmra.mxu0 %vm351_vm1, %v306_v60  ;;  %1497 = vmatmul.mubr.msk.f32.gmra.mxu1 %vm351_vm1, %v306_v60  ;;  %v780_v19 = vld [vmem:[%s2698_s3 + $0x2c8] sm:$0xff]  ;;  %v779_v21 = vld [vmem:[%s2698_s3 + $0x2c0] sm:$0xff]  ;;  %v714_v22 = vld [vmem:[%s2698_s3 + $0xb8] sm:$0xff] }
  0x40   : > { %565 = vmatprep.subr.mxu0 %v320_v61  ;;  %642 = vmatprep.subr.mxu1 %v322_v62  ;;  %v778_v23 = vld [vmem:[%s2698_s3 + $0x2b8] sm:$0xff]  ;;  %v713_v24 = vld [vmem:[%s2698_s3 + $0xb0] sm:$0xff]  ;;  %v712_v26 = vld [vmem:[%s2698_s3 + $0xa8] sm:$0xff] }
  0x41   : > { %566 = vmatpush1.msra.mxu0 %v319_v63  ;;  %643 = vmatpush1.msra.mxu1 %v321_v0  ;;  %v777_v25 = vld [vmem:[%s2698_s3 + $0x2b0] sm:$0xff]  ;;  %v776_v27 = vld [vmem:[%s2698_s3 + $0x2a8] sm:$0xff]  ;;  %v711_v28 = vld [vmem:[%s2698_s3 + $0xa0] sm:$0xff] }
  0x42   : > { %567 = vmatprep.subr.mxu0 %v312_v1  ;;  %644 = vmatprep.subr.mxu1 %v314_v2  ;;  %v775_v29 = vld [vmem:[%s2698_s3 + $0x2a0] sm:$0xff]  ;;  %v710_v30 = vld [vmem:[%s2698_s3 + $0x98] sm:$0xff]  ;;  %v773_v33 = vld [vmem:[%s2698_s3 + $0x290] sm:$0xff] }
  0x43   : > { %568 = vmatpush1.msra.mxu0 %v311_v3  ;;  %601 = vmatprep.mubr.f32.mxu0 %v1622_v32  ;;  %v774_v31 = vld [vmem:[%s2698_s3 + $0x298] sm:$0xff]  ;;  %v708_v34 = vld [vmem:[%s2698_s3 + $0x88] sm:$0xff]  ;;  %v707_v36 = vld [vmem:[%s2698_s3 + $0x80] sm:$0xff] }
  0x44   : > { %645 = vmatpush1.msra.mxu1 %v313_v4  ;;  %678 = vmatprep.mubr.f32.mxu1 %v1622_v32  ;;  %v772_v35 = vld [vmem:[%s2698_s3 + $0x288] sm:$0xff]  ;;  %v771_v37 = vld [vmem:[%s2698_s3 + $0x280] sm:$0xff]  ;;  %v706_v38 = vld [vmem:[%s2698_s3 + $0x78] sm:$0xff] }
  0x45   : > { %1500 = vmatmul.mubr.msk.f32.vlgmr.msra.gmra.mxu0 %vm351_vm1, %v305_v51  ;;  %1504 = vmatmul.mubr.msk.f32.vlgmr.msra.gmra.mxu1 %vm351_vm1, %v305_v51  ;;  %v770_v39 = vld [vmem:[%s2698_s3 + $0x278] sm:$0xff]  ;;  %v705_v40 = vld [vmem:[%s2698_s3 + $0x70] sm:$0xff]  ;;  %v704_v42 = vld [vmem:[%s2698_s3 + $0x68] sm:$0xff] }
  0x46   : > { %607 = vmatprep.mubr.f32.mxu0 %v1622_v32  ;;  %684 = vmatprep.mubr.f32.mxu1 %v1622_v32  ;;  %v709_v32 = vld [vmem:[%s2698_s3 + $0x90] sm:$0xff]  ;;  %v768_v43 = vld [vmem:[%s2698_s3 + $0x268] sm:$0xff]  ;;  %v703_v44 = vld [vmem:[%s2698_s3 + $0x60] sm:$0xff] }
  0x47   : > { %348 = vperm.xlu0 %1559, %v340_v5   ;;  %947 = vmatprep.subr.mxu0 %v722_v6  ;;  %v769_v41 = vld [vmem:[%s2698_s3 + $0x270] sm:$0xff]  ;;  %v767_v45 = vld [vmem:[%s2698_s3 + $0x260] sm:$0xff]  ;;  %v702_v46 = vld [vmem:[%s2698_s3 + $0x58] sm:$0xff] }
  0x48   : > { %1022 = vmatprep.subr.mxu1 %v786_v7  ;;  %948 = vmatpush1.msra.mxu0 %v721_v8  ;;  %v766_v47 = vld [vmem:[%s2698_s3 + $0x258] sm:$0xff]  ;;  %v701_v48 = vld [vmem:[%s2698_s3 + $0x50] sm:$0xff]  ;;  %v700_v50 = vld [vmem:[%s2698_s3 + $0x48] sm:$0xff] }
  0x49   : > { %1501 = vmatmul.mubr.msk.f32.gmra.mxu0 %vm351_vm1, %v306_v60  ;;  %1505 = vmatmul.mubr.msk.f32.gmra.mxu1 %vm351_vm1, %v306_v60  ;;  %v765_v49 = vld [vmem:[%s2698_s3 + $0x250] sm:$0xff]  ;;  %v764_v51 = vld [vmem:[%s2698_s3 + $0x248] sm:$0xff]  ;;  %v699_v52 = vld [vmem:[%s2698_s3 + $0x40] sm:$0xff] }
  0x4a   : > { %1023 = vmatpush1.msra.mxu1 %v785_v9  ;;  %949 = vmatprep.subr.mxu0 %v720_v10  ;;  %v763_v53 = vld [vmem:[%s2698_s3 + $0x240] sm:$0xff]  ;;  %v698_v54 = vld [vmem:[%s2698_s3 + $0x38] sm:$0xff]  ;;  %v697_v56 = vld [vmem:[%s2698_s3 + $0x30] sm:$0xff] }
  0x4b   : > { %1024 = vmatprep.subr.mxu1 %v784_v11  ;;  %950 = vmatpush1.msra.mxu0 %v719_v12  ;;  %v762_v55 = vld [vmem:[%s2698_s3 + $0x238] sm:$0xff]  ;;  %v761_v57 = vld [vmem:[%s2698_s3 + $0x230] sm:$0xff]  ;;  %v696_v58 = vld [vmem:[%s2698_s3 + $0x28] sm:$0xff] }
  0x4c   : > { %1025 = vmatpush1.msra.mxu1 %v783_v13  ;;  %951 = vmatprep.subr.mxu0 %v718_v14  ;;  %v760_v59 = vld [vmem:[%s2698_s3 + $0x228] sm:$0xff]  ;;  %v695_v60 = vld [vmem:[%s2698_s3 + $0x20] sm:$0xff]  ;;  %v694_v62 = vld [vmem:[%s2698_s3 + $0x18] sm:$0xff] }
  0x4d   : > { %1026 = vmatprep.subr.mxu1 %v782_v15  ;;  %952 = vmatpush1.msra.mxu0 %v717_v16  ;;  %v759_v61 = vld [vmem:[%s2698_s3 + $0x220] sm:$0xff]  ;;  %v758_v63 = vld [vmem:[%s2698_s3 + $0x218] sm:$0xff]  ;;  %v693_v0 = vld [vmem:[%s2698_s3 + $0x10] sm:$0xff] }
  0x4e   : > { %1027 = vmatpush1.msra.mxu1 %v781_v17  ;;  %953 = vmatprep.subr.mxu0 %v716_v18  ;;  %v757_v1 = vld [vmem:[%s2698_s3 + $0x210] sm:$0xff]  ;;  %v692_v2 = vld [vmem:[%s2698_s3 + $0x8] sm:$0xff]  ;;  %v691_v4 = vld [vmem:[%s2698_s3] sm:$0xff] }
  0x4f   : > { %1028 = vmatprep.subr.mxu1 %v780_v19  ;;  %954 = vmatpush1.msra.mxu0 %v715_v20  ;;  %v756_v3 = vld [vmem:[%s2698_s3 + $0x208] sm:$0xff]  ;;  %v755_v5 = vld [vmem:[%s2698_s3 + $0x200] sm:$0xff]  ;;  %v754_v6 = vld [vmem:[%s2698_s3 + $0x1f8] sm:$0xff] }
  0x50   : > { %1029 = vmatpush1.msra.mxu1 %v779_v21  ;;  %955 = vmatprep.subr.mxu0 %v714_v22  ;;  %v818_v7 = vld [vmem:[%s2698_s3 + $0x3f8] sm:$0xff]  ;;  %v753_v8 = vld [vmem:[%s2698_s3 + $0x1f0] sm:$0xff]  ;;  %v752_v10 = vld [vmem:[%s2698_s3 + $0x1e8] sm:$0xff] }
  0x51   : > { %1030 = vmatprep.subr.mxu1 %v778_v23  ;;  %956 = vmatpush1.msra.mxu0 %v713_v24  ;;  %v817_v9 = vld [vmem:[%s2698_s3 + $0x3f0] sm:$0xff]  ;;  %v816_v11 = vld [vmem:[%s2698_s3 + $0x3e8] sm:$0xff]  ;;  %v751_v12 = vld [vmem:[%s2698_s3 + $0x1e0] sm:$0xff] }
  0x52   : > { %1031 = vmatpush1.msra.mxu1 %v777_v25  ;;  %957 = vmatprep.subr.mxu0 %v712_v26  ;;  %v815_v13 = vld [vmem:[%s2698_s3 + $0x3e0] sm:$0xff]  ;;  %v750_v14 = vld [vmem:[%s2698_s3 + $0x1d8] sm:$0xff]  ;;  %v749_v16 = vld [vmem:[%s2698_s3 + $0x1d0] sm:$0xff] }
  0x53   : > { %1032 = vmatprep.subr.mxu1 %v776_v27  ;;  %958 = vmatpush1.msra.mxu0 %v711_v28  ;;  %v814_v15 = vld [vmem:[%s2698_s3 + $0x3d8] sm:$0xff]  ;;  %v813_v17 = vld [vmem:[%s2698_s3 + $0x3d0] sm:$0xff]  ;;  %v748_v18 = vld [vmem:[%s2698_s3 + $0x1c8] sm:$0xff] }
  0x54   : > { %1033 = vmatpush1.msra.mxu1 %v775_v29  ;;  %959 = vmatprep.subr.mxu0 %v710_v30  ;;  %v812_v19 = vld [vmem:[%s2698_s3 + $0x3c8] sm:$0xff]  ;;  %v747_v20 = vld [vmem:[%s2698_s3 + $0x1c0] sm:$0xff]  ;;  %v746_v22 = vld [vmem:[%s2698_s3 + $0x1b8] sm:$0xff] }
  0x55   : > { %1034 = vmatprep.subr.mxu1 %v774_v31  ;;  %960 = vmatpush1.msra.mxu0 %v709_v32  ;;  %v811_v21 = vld [vmem:[%s2698_s3 + $0x3c0] sm:$0xff]  ;;  %v810_v23 = vld [vmem:[%s2698_s3 + $0x3b8] sm:$0xff]  ;;  %v745_v24 = vld [vmem:[%s2698_s3 + $0x1b0] sm:$0xff] }
  0x56   : > { %1035 = vmatpush1.msra.mxu1 %v773_v33  ;;  %961 = vmatprep.subr.mxu0 %v708_v34  ;;  %v809_v25 = vld [vmem:[%s2698_s3 + $0x3b0] sm:$0xff]  ;;  %v744_v26 = vld [vmem:[%s2698_s3 + $0x1a8] sm:$0xff]  ;;  %v743_v28 = vld [vmem:[%s2698_s3 + $0x1a0] sm:$0xff] }
  0x57   : > { %1036 = vmatprep.subr.mxu1 %v772_v35  ;;  %962 = vmatpush1.msra.mxu0 %v707_v36  ;;  %v808_v27 = vld [vmem:[%s2698_s3 + $0x3a8] sm:$0xff]  ;;  %v807_v29 = vld [vmem:[%s2698_s3 + $0x3a0] sm:$0xff]  ;;  %v742_v30 = vld [vmem:[%s2698_s3 + $0x198] sm:$0xff] }
  0x58   : > { %1037 = vmatpush1.msra.mxu1 %v771_v37  ;;  %963 = vmatprep.subr.mxu0 %v706_v38  ;;  %v806_v31 = vld [vmem:[%s2698_s3 + $0x398] sm:$0xff]  ;;  %v741_v32 = vld [vmem:[%s2698_s3 + $0x190] sm:$0xff]  ;;  %v740_v34 = vld [vmem:[%s2698_s3 + $0x188] sm:$0xff] }
  0x59   : > { %1038 = vmatprep.subr.mxu1 %v770_v39  ;;  %964 = vmatpush1.msra.mxu0 %v705_v40  ;;  %v805_v33 = vld [vmem:[%s2698_s3 + $0x390] sm:$0xff]  ;;  %v804_v35 = vld [vmem:[%s2698_s3 + $0x388] sm:$0xff]  ;;  %v739_v36 = vld [vmem:[%s2698_s3 + $0x180] sm:$0xff] }
  0x5a   : > { %1039 = vmatpush1.msra.mxu1 %v769_v41  ;;  %965 = vmatprep.subr.mxu0 %v704_v42  ;;  %v803_v37 = vld [vmem:[%s2698_s3 + $0x380] sm:$0xff]  ;;  %v738_v38 = vld [vmem:[%s2698_s3 + $0x178] sm:$0xff]  ;;  %v737_v40 = vld [vmem:[%s2698_s3 + $0x170] sm:$0xff] }
  0x5b   : > { %1040 = vmatprep.subr.mxu1 %v768_v43  ;;  %966 = vmatpush1.msra.mxu0 %v703_v44  ;;  %v802_v39 = vld [vmem:[%s2698_s3 + $0x378] sm:$0xff]  ;;  %v801_v41 = vld [vmem:[%s2698_s3 + $0x370] sm:$0xff]  ;;  %v736_v42 = vld [vmem:[%s2698_s3 + $0x168] sm:$0xff] }
  0x5c   : > { %1041 = vmatpush1.msra.mxu1 %v767_v45  ;;  %967 = vmatprep.subr.mxu0 %v702_v46  ;;  %v800_v43 = vld [vmem:[%s2698_s3 + $0x368] sm:$0xff]  ;;  %v735_v44 = vld [vmem:[%s2698_s3 + $0x160] sm:$0xff]  ;;  %v734_v46 = vld [vmem:[%s2698_s3 + $0x158] sm:$0xff] }
  0x5d   : > { %1042 = vmatprep.subr.mxu1 %v766_v47  ;;  %968 = vmatpush1.msra.mxu0 %v701_v48  ;;  %v799_v45 = vld [vmem:[%s2698_s3 + $0x360] sm:$0xff]  ;;  %v798_v47 = vld [vmem:[%s2698_s3 + $0x358] sm:$0xff]  ;;  %v733_v48 = vld [vmem:[%s2698_s3 + $0x150] sm:$0xff] }
  0x5e   : > { %1043 = vmatpush1.msra.mxu1 %v765_v49  ;;  %969 = vmatprep.subr.mxu0 %v700_v50  ;;  %v797_v49 = vld [vmem:[%s2698_s3 + $0x350] sm:$0xff]  ;;  %v732_v50 = vld [vmem:[%s2698_s3 + $0x148] sm:$0xff] }
  0x5f   : > { %1044 = vmatprep.subr.mxu1 %v764_v51  ;;  %970 = vmatpush1.msra.mxu0 %v699_v52  ;;  %v796_v51 = vld [vmem:[%s2698_s3 + $0x348] sm:$0xff]  ;;  %v731_v52 = vld [vmem:[%s2698_s3 + $0x140] sm:$0xff] }
  0x60   : > { %1045 = vmatpush1.msra.mxu1 %v763_v53  ;;  %971 = vmatprep.subr.mxu0 %v698_v54  ;;  %v795_v53 = vld [vmem:[%s2698_s3 + $0x340] sm:$0xff]  ;;  %v730_v54 = vld [vmem:[%s2698_s3 + $0x138] sm:$0xff] }
  0x61   : > { %1046 = vmatprep.subr.mxu1 %v762_v55  ;;  %972 = vmatpush1.msra.mxu0 %v697_v56  ;;  %v794_v55 = vld [vmem:[%s2698_s3 + $0x338] sm:$0xff]  ;;  %v729_v56 = vld [vmem:[%s2698_s3 + $0x130] sm:$0xff] }
  0x62   : > { %1047 = vmatpush1.msra.mxu1 %v761_v57  ;;  %973 = vmatprep.subr.mxu0 %v696_v58  ;;  %v793_v57 = vld [vmem:[%s2698_s3 + $0x330] sm:$0xff]  ;;  %v728_v58 = vld [vmem:[%s2698_s3 + $0x128] sm:$0xff] }
  0x63   : > { %1048 = vmatprep.subr.mxu1 %v760_v59  ;;  %974 = vmatpush1.msra.mxu0 %v695_v60  ;;  %v792_v59 = vld [vmem:[%s2698_s3 + $0x328] sm:$0xff]  ;;  %v727_v60 = vld [vmem:[%s2698_s3 + $0x120] sm:$0xff] }
  0x64   : > { %1049 = vmatpush1.msra.mxu1 %v759_v61  ;;  %975 = vmatprep.subr.mxu0 %v694_v62  ;;  %v791_v61 = vld [vmem:[%s2698_s3 + $0x320] sm:$0xff]  ;;  %v726_v62 = vld [vmem:[%s2698_s3 + $0x118] sm:$0xff] }
  0x65   : > { %1050 = vmatprep.subr.mxu1 %v758_v63  ;;  %976 = vmatpush1.msra.mxu0 %v693_v0  ;;  %v790_v63 = vld [vmem:[%s2698_s3 + $0x318] sm:$0xff]  ;;  %v725_v0 = vld [vmem:[%s2698_s3 + $0x110] sm:$0xff] }
  0x66   : > { %1051 = vmatpush1.msra.mxu1 %v757_v1  ;;  %977 = vmatprep.subr.mxu0 %v692_v2  ;;  %v789_v1 = vld [vmem:[%s2698_s3 + $0x310] sm:$0xff]  ;;  %v724_v2 = vld [vmem:[%s2698_s3 + $0x108] sm:$0xff] }
  0x67   : > { %1052 = vmatprep.subr.mxu1 %v756_v3  ;;  %978 = vmatpush1.msra.mxu0 %v691_v4  ;;  %v788_v3 = vld [vmem:[%s2698_s3 + $0x308] sm:$0xff]  ;;  %v723_v4 = vld [vmem:[%s2698_s3 + $0x100] sm:$0xff] }
  0x68   : > { %1053 = vmatpush1.msra.mxu1 %v755_v5  ;;  %979 = vmatprep.subr.mxu0 %v754_v6  ;;  %v787_v5 = vld [vmem:[%s2698_s3 + $0x300] sm:$0xff]  ;;  %v850_v6 = vld [vmem:[%s2698_s3 + $0x4f8] sm:$0xff] }
  0x69   : > { %1054 = vmatprep.subr.mxu1 %v818_v7  ;;  %980 = vmatpush2.msra.mxu0 %v753_v8  ;;  %v914_v7 = vld [vmem:[%s2698_s3 + $0x6f8] sm:$0xff] }
  0x6a   : > { %1055 = vmatpush2.msra.mxu1 %v817_v9  ;;  %981 = vmatprep.subr.mxu0 %v752_v10 }
  0x6b   : > { %1056 = vmatprep.subr.mxu1 %v816_v11  ;;  %982 = vmatpush2.msra.mxu0 %v751_v12 }
  0x6c   : > { %1057 = vmatpush2.msra.mxu1 %v815_v13  ;;  %983 = vmatprep.subr.mxu0 %v750_v14 }
  0x6d   : > { %1058 = vmatprep.subr.mxu1 %v814_v15  ;;  %984 = vmatpush2.msra.mxu0 %v749_v16 }
  0x6e   : > { %1059 = vmatpush2.msra.mxu1 %v813_v17  ;;  %985 = vmatprep.subr.mxu0 %v748_v18  ;;  %v849_v17 = vld [vmem:[%s2698_s3 + $0x4f0] sm:$0xff] }
  0x6f   : > { %1060 = vmatprep.subr.mxu1 %v812_v19  ;;  %986 = vmatpush2.msra.mxu0 %v747_v20  ;;  %v913_v18 = vld [vmem:[%s2698_s3 + $0x6f0] sm:$0xff]  ;;  %v848_v19 = vld [vmem:[%s2698_s3 + $0x4e8] sm:$0xff] }
  0x70   : > { %1061 = vmatpush2.msra.mxu1 %v811_v21  ;;  %987 = vmatprep.subr.mxu0 %v746_v22  ;;  %v912_v20 = vld [vmem:[%s2698_s3 + $0x6e8] sm:$0xff] }
  0x71   : > { %1062 = vmatprep.subr.mxu1 %v810_v23  ;;  %988 = vmatpush2.msra.mxu0 %v745_v24  ;;  %v847_v23 = vld [vmem:[%s2698_s3 + $0x4e0] sm:$0xff] }
  0x72   : > { %1063 = vmatpush2.msra.mxu1 %v809_v25  ;;  %989 = vmatprep.subr.mxu0 %v744_v26  ;;  %v911_v24 = vld [vmem:[%s2698_s3 + $0x6e0] sm:$0xff]  ;;  %v846_v26 = vld [vmem:[%s2698_s3 + $0x4d8] sm:$0xff] }
  0x73   : > { %1064 = vmatprep.subr.mxu1 %v808_v27  ;;  %990 = vmatpush2.msra.mxu0 %v743_v28  ;;  %v910_v27 = vld [vmem:[%s2698_s3 + $0x6d8] sm:$0xff] }
  0x74   : > { %1065 = vmatpush2.msra.mxu1 %v807_v29  ;;  %991 = vmatprep.subr.mxu0 %v742_v30 }
  0x75   : > { %1066 = vmatprep.subr.mxu1 %v806_v31  ;;  %992 = vmatpush2.msra.mxu0 %v741_v32 }
  0x76   : > { %1067 = vmatpush2.msra.mxu1 %v805_v33  ;;  %993 = vmatprep.subr.mxu0 %v740_v34  ;;  %v845_v34 = vld [vmem:[%s2698_s3 + $0x4d0] sm:$0xff] }
  0x77   : > { %1068 = vmatprep.subr.mxu1 %v804_v35  ;;  %994 = vmatpush2.msra.mxu0 %v739_v36  ;;  %v909_v35 = vld [vmem:[%s2698_s3 + $0x6d0] sm:$0xff]  ;;  %v844_v36 = vld [vmem:[%s2698_s3 + $0x4c8] sm:$0xff] }
  0x78   : > { %1069 = vmatpush2.msra.mxu1 %v803_v37  ;;  %995 = vmatprep.subr.mxu0 %v738_v38  ;;  %v908_v37 = vld [vmem:[%s2698_s3 + $0x6c8] sm:$0xff] }
  0x79   : > { %1070 = vmatprep.subr.mxu1 %v802_v39  ;;  %996 = vmatpush2.msra.mxu0 %v737_v40  ;;  %v843_v40 = vld [vmem:[%s2698_s3 + $0x4c0] sm:$0xff] }
  0x7a   : > { %1071 = vmatpush2.msra.mxu1 %v801_v41  ;;  %997 = vmatprep.subr.mxu0 %v736_v42  ;;  %v907_v41 = vld [vmem:[%s2698_s3 + $0x6c0] sm:$0xff]  ;;  %v842_v42 = vld [vmem:[%s2698_s3 + $0x4b8] sm:$0xff] }
  0x7b   : > { %1072 = vmatprep.subr.mxu1 %v800_v43  ;;  %998 = vmatpush2.msra.mxu0 %v735_v44  ;;  %v906_v43 = vld [vmem:[%s2698_s3 + $0x6b8] sm:$0xff] }
  0x7c   : > { %1073 = vmatpush2.msra.mxu1 %v799_v45  ;;  %999 = vmatprep.subr.mxu0 %v734_v46 }
  0x7d   : > { %1074 = vmatprep.subr.mxu1 %v798_v47  ;;  %1000 = vmatpush2.msra.mxu0 %v733_v48  ;;  %v841_v48 = vld [vmem:[%s2698_s3 + $0x4b0] sm:$0xff] }
  0x7e   : > { %1075 = vmatpush2.msra.mxu1 %v797_v49  ;;  %1001 = vmatprep.subr.mxu0 %v732_v50  ;;  %v905_v49 = vld [vmem:[%s2698_s3 + $0x6b0] sm:$0xff]  ;;  %v840_v50 = vld [vmem:[%s2698_s3 + $0x4a8] sm:$0xff] }
  0x7f   : > { %1076 = vmatprep.subr.mxu1 %v796_v51  ;;  %1002 = vmatpush2.msra.mxu0 %v731_v52  ;;  %v904_v51 = vld [vmem:[%s2698_s3 + $0x6a8] sm:$0xff]  ;;  %v839_v52 = vld [vmem:[%s2698_s3 + $0x4a0] sm:$0xff] }
  0x80   : > { %1077 = vmatpush2.msra.mxu1 %v795_v53  ;;  %1003 = vmatprep.subr.mxu0 %v730_v54  ;;  %v903_v53 = vld [vmem:[%s2698_s3 + $0x6a0] sm:$0xff]  ;;  %v838_v54 = vld [vmem:[%s2698_s3 + $0x498] sm:$0xff] }
  0x81   : > { %1078 = vmatprep.subr.mxu1 %v794_v55  ;;  %1004 = vmatpush2.msra.mxu0 %v729_v56  ;;  %v902_v55 = vld [vmem:[%s2698_s3 + $0x698] sm:$0xff]  ;;  %v837_v56 = vld [vmem:[%s2698_s3 + $0x490] sm:$0xff] }
  0x82   : > { %1079 = vmatpush2.msra.mxu1 %v793_v57  ;;  %1005 = vmatprep.subr.mxu0 %v728_v58  ;;  %v901_v57 = vld [vmem:[%s2698_s3 + $0x690] sm:$0xff]  ;;  %v836_v58 = vld [vmem:[%s2698_s3 + $0x488] sm:$0xff] }
  0x83   : > { %1080 = vmatprep.subr.mxu1 %v792_v59  ;;  %1006 = vmatpush2.msra.mxu0 %v727_v60  ;;  %v900_v59 = vld [vmem:[%s2698_s3 + $0x688] sm:$0xff]  ;;  %v835_v60 = vld [vmem:[%s2698_s3 + $0x480] sm:$0xff] }
  0x84   : > { %1081 = vmatpush2.msra.mxu1 %v791_v61  ;;  %1007 = vmatprep.subr.mxu0 %v726_v62  ;;  %v899_v61 = vld [vmem:[%s2698_s3 + $0x680] sm:$0xff]  ;;  %v834_v62 = vld [vmem:[%s2698_s3 + $0x478] sm:$0xff] }
  0x85   : > { %1082 = vmatprep.subr.mxu1 %v790_v63  ;;  %1008 = vmatpush2.msra.mxu0 %v725_v0  ;;  %v898_v63 = vld [vmem:[%s2698_s3 + $0x678] sm:$0xff]  ;;  %v833_v0 = vld [vmem:[%s2698_s3 + $0x470] sm:$0xff] }
  0x86   : > { %1083 = vmatpush2.msra.mxu1 %v789_v1  ;;  %1009 = vmatprep.subr.mxu0 %v724_v2  ;;  %v897_v1 = vld [vmem:[%s2698_s3 + $0x670] sm:$0xff]  ;;  %v832_v2 = vld [vmem:[%s2698_s3 + $0x468] sm:$0xff] }
  0x87   : > { %1084 = vmatprep.subr.mxu1 %v788_v3  ;;  %1010 = vmatpush2.msra.mxu0 %v723_v4  ;;  %v896_v3 = vld [vmem:[%s2698_s3 + $0x668] sm:$0xff]  ;;  %v831_v4 = vld [vmem:[%s2698_s3 + $0x460] sm:$0xff] }
  0x88   : > { %1085 = vmatpush2.msra.mxu1 %v787_v5  ;;  %1097 = vmatprep.subr.mxu0 %v850_v6  ;;  %v895_v5 = vld [vmem:[%s2698_s3 + $0x660] sm:$0xff]  ;;  %v830_v6 = vld [vmem:[%s2698_s3 + $0x458] sm:$0xff] }
  0x89   : > { %1172 = vmatprep.subr.mxu1 %v914_v7  ;;  %v894_v7 = vld [vmem:[%s2698_s3 + $0x658] sm:$0xff] }
  0xac   : > { %v2251_v10 = vpop.permute.xlu0 %343 }
  0xc2   : > { %v2275_v25 = vpop.permute.xlu0 %348 }
  0xf9   : > { %v449_v8 = vpop.f32.mrf.mxu0  ;;  %v526_v9 = vpop.f32.mrf.mxu1 }
  0xfa   : > { %v527_v11 = vadd.f32 %v526_v9, %v2251_v10  ;;  %v450_v16 = vadd.f32 %v449_v8, %v2251_v10  ;;  %v829_v8 = vld [vmem:[%s2698_s3 + $0x450] sm:$0xff] }
  0xfb   : > { %v451_v12 = vpop.f32.mrf.mxu0  ;;  %v528_v13 = vpop.f32.mrf.mxu1  ;;  %v893_v9 = vld [vmem:[%s2698_s3 + $0x650] sm:$0xff] }
  0xfc   : > { %v452_v14 = vadd.f32 %v451_v12, %v2251_v10  ;;  %v529_v15 = vadd.f32 %v528_v13, %v2251_v10  ;;  %v892_v12 = vld [vmem:[%s2698_s3 + $0x648] sm:$0xff]  ;;  %v827_v13 = vld [vmem:[%s2698_s3 + $0x440] sm:$0xff] }
  0xfe   : > { %1011 = vmatprep.mubr.f32.mxu0 %v452_v14  ;;  %1086 = vmatprep.mubr.f32.mxu1 %v529_v15  ;;  %v891_v14 = vld [vmem:[%s2698_s3 + $0x640] sm:$0xff]  ;;  %v826_v15 = vld [vmem:[%s2698_s3 + $0x438] sm:$0xff] }
  0xff   : > { %v455_v21 = vpop.f32.mrf.mxu0  ;;  %v532_v22 = vpop.f32.mrf.mxu1  ;;  %1012 = vmatmul.mubr.f32.vlgmr.msra.gmra.mxu0 %v450_v16  ;;  %1087 = vmatmul.mubr.f32.vlgmr.msra.gmra.mxu1 %v527_v11  ;;  %v828_v11 = vld [vmem:[%s2698_s3 + $0x448] sm:$0xff]  ;;  %v890_v16 = vld [vmem:[%s2698_s3 + $0x638] sm:$0xff] }
 0x100   : > { %1098 = vmatpush1.msra.mxu0 %v849_v17  ;;  %1173 = vmatpush1.msra.mxu1 %v913_v18  ;;  %v456_v32 = vadd.f32 %v455_v21, %v2275_v25  ;;  %v533_v33 = vadd.f32 %v532_v22, %v2275_v25  ;;  %v825_v17 = vld [vmem:[%s2698_s3 + $0x430] sm:$0xff]  ;;  %v823_v21 = vld [vmem:[%s2698_s3 + $0x420] sm:$0xff] }
 0x101   : > { %v457_v28 = vpop.f32.mrf.mxu0  ;;  %v534_v29 = vpop.f32.mrf.mxu1  ;;  %1099 = vmatprep.subr.mxu0 %v848_v19  ;;  %1174 = vmatprep.subr.mxu1 %v912_v20  ;;  %v889_v18 = vld [vmem:[%s2698_s3 + $0x630] sm:$0xff]  ;;  %v824_v19 = vld [vmem:[%s2698_s3 + $0x428] sm:$0xff]  ;;  %v887_v22 = vld [vmem:[%s2698_s3 + $0x620] sm:$0xff] }
 0x102   : > { %v458_v30 = vadd.f32 %v457_v28, %v2275_v25  ;;  %v535_v31 = vadd.f32 %v534_v29, %v2275_v25  ;;  %1100 = vmatpush1.msra.mxu0 %v847_v23  ;;  %1175 = vmatpush1.msra.mxu1 %v911_v24  ;;  %v888_v20 = vld [vmem:[%s2698_s3 + $0x628] sm:$0xff]  ;;  %v822_v23 = vld [vmem:[%s2698_s3 + $0x418] sm:$0xff] }
 0x103   : > { %1101 = vmatprep.subr.mxu0 %v846_v26  ;;  %1176 = vmatprep.subr.mxu1 %v910_v27  ;;  %v886_v24 = vld [vmem:[%s2698_s3 + $0x618] sm:$0xff]  ;;  %v821_v26 = vld [vmem:[%s2698_s3 + $0x410] sm:$0xff]  ;;  %v820_v28 = vld [vmem:[%s2698_s3 + $0x408] sm:$0xff] }
 0x104   : > { %1016 = vmatprep.mubr.f32.mxu0 %v458_v30  ;;  %1091 = vmatprep.mubr.f32.mxu1 %v535_v31  ;;  %v885_v27 = vld [vmem:[%s2698_s3 + $0x610] sm:$0xff]  ;;  %v884_v29 = vld [vmem:[%s2698_s3 + $0x608] sm:$0xff]  ;;  %v819_v30 = vld [vmem:[%s2698_s3 + $0x400] sm:$0xff] }
 0x105   : > { %v2299_v38 = vpop.f32.mrf.mxu0  ;;  %v2301_v39 = vpop.f32.mrf.mxu1  ;;  %1017 = vmatmul.mubr.f32.gmra.mxu0 %v456_v32  ;;  %1092 = vmatmul.mubr.f32.gmra.mxu1 %v533_v33  ;;  %v883_v31 = vld [vmem:[%s2698_s3 + $0x600] sm:$0xff]  ;;  %v882_v32 = vld [vmem:[%s2698_s3 + $0x5f8] sm:$0xff] }
 0x106   : > { %1102 = vmatpush1.msra.mxu0 %v845_v34  ;;  %1177 = vmatpush1.msra.mxu1 %v909_v35  ;;  %v946_v33 = vld [vmem:[%s2698_s3 + $0x7f8] sm:$0xff]  ;;  %v881_v34 = vld [vmem:[%s2698_s3 + $0x5f0] sm:$0xff] }
 0x107   : > { %v605_v44 = vpop.f32.mrf.mxu0  ;;  %v682_v45 = vpop.f32.mrf.mxu1  ;;  %1103 = vmatprep.subr.mxu0 %v844_v36  ;;  %1178 = vmatprep.subr.mxu1 %v908_v37  ;;  %v945_v35 = vld [vmem:[%s2698_s3 + $0x7f0] sm:$0xff]  ;;  %v880_v36 = vld [vmem:[%s2698_s3 + $0x5e8] sm:$0xff] }
 0x108   : > { %v606_v46 = vadd.f32 %v605_v44, %v2251_v10  ;;  %v683_v47 = vadd.f32 %v682_v45, %v2251_v10  ;;  %1104 = vmatpush1.msra.mxu0 %v843_v40  ;;  %1179 = vmatpush1.msra.mxu1 %v907_v41  ;;  %v944_v37 = vld [vmem:[%s2698_s3 + $0x7e8] sm:$0xff]  ;;  %v879_v40 = vld [vmem:[%s2698_s3 + $0x5e0] sm:$0xff]  ;;  %v877_v44 = vld [vmem:[%s2698_s3 + $0x5d0] sm:$0xff] }
 0x109   : > { %1105 = vmatprep.subr.mxu0 %v842_v42  ;;  %1180 = vmatprep.subr.mxu1 %v906_v43  ;;  %v943_v41 = vld [vmem:[%s2698_s3 + $0x7e0] sm:$0xff]  ;;  %v878_v42 = vld [vmem:[%s2698_s3 + $0x5d8] sm:$0xff]  ;;  %v941_v45 = vld [vmem:[%s2698_s3 + $0x7d0] sm:$0xff] }
 0x10a   : > { %1161 = vmatprep.mubr.f32.mxu0 %v606_v46  ;;  %1236 = vmatprep.mubr.f32.mxu1 %v683_v47  ;;  %v942_v43 = vld [vmem:[%s2698_s3 + $0x7d8] sm:$0xff]  ;;  %v876_v46 = vld [vmem:[%s2698_s3 + $0x5c8] sm:$0xff] }
 0x10b   : > { %1106 = vmatpush1.msra.mxu0 %v841_v48  ;;  %1181 = vmatpush1.msra.mxu1 %v905_v49  ;;  %v940_v47 = vld [vmem:[%s2698_s3 + $0x7c8] sm:$0xff]  ;;  %v875_v48 = vld [vmem:[%s2698_s3 + $0x5c0] sm:$0xff] }
 0x10c   : > { %1107 = vmatprep.subr.mxu0 %v840_v50  ;;  %1182 = vmatprep.subr.mxu1 %v904_v51  ;;  %v939_v49 = vld [vmem:[%s2698_s3 + $0x7c0] sm:$0xff]  ;;  %v874_v50 = vld [vmem:[%s2698_s3 + $0x5b8] sm:$0xff] }
 0x10d   : > { %1108 = vmatpush1.msra.mxu0 %v839_v52  ;;  %1183 = vmatpush1.msra.mxu1 %v903_v53  ;;  %v938_v51 = vld [vmem:[%s2698_s3 + $0x7b8] sm:$0xff]  ;;  %v873_v52 = vld [vmem:[%s2698_s3 + $0x5b0] sm:$0xff] }
 0x10e   : > { %1109 = vmatprep.subr.mxu0 %v838_v54  ;;  %1184 = vmatprep.subr.mxu1 %v902_v55  ;;  %v937_v53 = vld [vmem:[%s2698_s3 + $0x7b0] sm:$0xff]  ;;  %v872_v54 = vld [vmem:[%s2698_s3 + $0x5a8] sm:$0xff] }
 0x10f   : > { %1110 = vmatpush1.msra.mxu0 %v837_v56  ;;  %1185 = vmatpush1.msra.mxu1 %v901_v57  ;;  %v936_v55 = vld [vmem:[%s2698_s3 + $0x7a8] sm:$0xff]  ;;  %v871_v56 = vld [vmem:[%s2698_s3 + $0x5a0] sm:$0xff] }
 0x110   : > { %1111 = vmatprep.subr.mxu0 %v836_v58  ;;  %1186 = vmatprep.subr.mxu1 %v900_v59  ;;  %v935_v57 = vld [vmem:[%s2698_s3 + $0x7a0] sm:$0xff]  ;;  %v870_v58 = vld [vmem:[%s2698_s3 + $0x598] sm:$0xff] }
 0x111   : > { %1112 = vmatpush1.msra.mxu0 %v835_v60  ;;  %1187 = vmatpush1.msra.mxu1 %v899_v61  ;;  %v934_v59 = vld [vmem:[%s2698_s3 + $0x798] sm:$0xff]  ;;  %v869_v60 = vld [vmem:[%s2698_s3 + $0x590] sm:$0xff] }
 0x112   : > { %1113 = vmatprep.subr.mxu0 %v834_v62  ;;  %1188 = vmatprep.subr.mxu1 %v898_v63  ;;  %v933_v61 = vld [vmem:[%s2698_s3 + $0x790] sm:$0xff]  ;;  %v868_v62 = vld [vmem:[%s2698_s3 + $0x588] sm:$0xff] }
 0x113   : > { %1114 = vmatpush1.msra.mxu0 %v833_v0  ;;  %1189 = vmatpush1.msra.mxu1 %v897_v1  ;;  %v932_v63 = vld [vmem:[%s2698_s3 + $0x788] sm:$0xff]  ;;  %v867_v0 = vld [vmem:[%s2698_s3 + $0x580] sm:$0xff] }
 0x114   : > { %1115 = vmatprep.subr.mxu0 %v832_v2  ;;  %1190 = vmatprep.subr.mxu1 %v896_v3  ;;  %v931_v1 = vld [vmem:[%s2698_s3 + $0x780] sm:$0xff]  ;;  %v866_v2 = vld [vmem:[%s2698_s3 + $0x578] sm:$0xff] }
 0x115   : > { %1116 = vmatpush1.msra.mxu0 %v831_v4  ;;  %1191 = vmatpush1.msra.mxu1 %v895_v5  ;;  %v930_v3 = vld [vmem:[%s2698_s3 + $0x778] sm:$0xff]  ;;  %v865_v4 = vld [vmem:[%s2698_s3 + $0x570] sm:$0xff] }
 0x116   : > { %1117 = vmatprep.subr.mxu0 %v830_v6  ;;  %1192 = vmatprep.subr.mxu1 %v894_v7  ;;  %v929_v5 = vld [vmem:[%s2698_s3 + $0x770] sm:$0xff]  ;;  %v864_v6 = vld [vmem:[%s2698_s3 + $0x568] sm:$0xff] }
 0x117   : > { %1118 = vmatpush1.msra.mxu0 %v829_v8  ;;  %1193 = vmatpush1.msra.mxu1 %v893_v9  ;;  %v928_v7 = vld [vmem:[%s2698_s3 + $0x768] sm:$0xff]  ;;  %v863_v8 = vld [vmem:[%s2698_s3 + $0x560] sm:$0xff] }
 0x118   : > { %1119 = vmatprep.subr.mxu0 %v828_v11  ;;  %1194 = vmatprep.subr.mxu1 %v892_v12  ;;  %v927_v9 = vld [vmem:[%s2698_s3 + $0x760] sm:$0xff]  ;;  %v862_v11 = vld [vmem:[%s2698_s3 + $0x558] sm:$0xff] }
 0x119   : > { %1120 = vmatpush1.msra.mxu0 %v827_v13  ;;  %1195 = vmatpush1.msra.mxu1 %v891_v14  ;;  %v926_v12 = vld [vmem:[%s2698_s3 + $0x758] sm:$0xff]  ;;  %v861_v13 = vld [vmem:[%s2698_s3 + $0x550] sm:$0xff] }
 0x11a   : > { %1121 = vmatprep.subr.mxu0 %v826_v15  ;;  %1196 = vmatprep.subr.mxu1 %v890_v16  ;;  %v925_v14 = vld [vmem:[%s2698_s3 + $0x750] sm:$0xff]  ;;  %v860_v15 = vld [vmem:[%s2698_s3 + $0x548] sm:$0xff] }
 0x11b   : > { %1122 = vmatpush1.msra.mxu0 %v825_v17  ;;  %1197 = vmatpush1.msra.mxu1 %v889_v18  ;;  %v924_v16 = vld [vmem:[%s2698_s3 + $0x748] sm:$0xff]  ;;  %v859_v17 = vld [vmem:[%s2698_s3 + $0x540] sm:$0xff] }
 0x11c   : > { %1123 = vmatprep.subr.mxu0 %v824_v19  ;;  %1198 = vmatprep.subr.mxu1 %v888_v20  ;;  %v923_v18 = vld [vmem:[%s2698_s3 + $0x740] sm:$0xff]  ;;  %v858_v19 = vld [vmem:[%s2698_s3 + $0x538] sm:$0xff] }
 0x11d   : > { %1124 = vmatpush1.msra.mxu0 %v823_v21  ;;  %1199 = vmatpush1.msra.mxu1 %v887_v22  ;;  %v922_v20 = vld [vmem:[%s2698_s3 + $0x738] sm:$0xff]  ;;  %v857_v21 = vld [vmem:[%s2698_s3 + $0x530] sm:$0xff] }
 0x11e   : > { %1125 = vmatprep.subr.mxu0 %v822_v23  ;;  %1200 = vmatprep.subr.mxu1 %v886_v24  ;;  %v921_v22 = vld [vmem:[%s2698_s3 + $0x730] sm:$0xff]  ;;  %v856_v23 = vld [vmem:[%s2698_s3 + $0x528] sm:$0xff] }
 0x11f   : > { %1126 = vmatpush1.msra.mxu0 %v821_v26  ;;  %1201 = vmatpush1.msra.mxu1 %v885_v27  ;;  %v920_v24 = vld [vmem:[%s2698_s3 + $0x728] sm:$0xff]  ;;  %v609_v26 = vpop.f32.mrf.mxu0  ;;  %v686_v27 = vpop.f32.mrf.mxu1 }
 0x120   : > { %1127 = vmatprep.subr.mxu0 %v820_v28  ;;  %1202 = vmatprep.subr.mxu1 %v884_v29  ;;  %v855_v28 = vld [vmem:[%s2698_s3 + $0x520] sm:$0xff] }
 0x121   : > { %1128 = vmatpush1.msra.mxu0 %v819_v30  ;;  %1203 = vmatpush1.msra.mxu1 %v883_v31  ;;  %v919_v29 = vld [vmem:[%s2698_s3 + $0x720] sm:$0xff]  ;;  %v854_v30 = vld [vmem:[%s2698_s3 + $0x518] sm:$0xff] }
 0x122   : > { %1129 = vmatprep.subr.mxu0 %v882_v32  ;;  %1204 = vmatprep.subr.mxu1 %v946_v33  ;;  %v918_v31 = vld [vmem:[%s2698_s3 + $0x718] sm:$0xff]  ;;  %v853_v32 = vld [vmem:[%s2698_s3 + $0x510] sm:$0xff] }
 0x123   : > { %1130 = vmatpush2.msra.mxu0 %v881_v34  ;;  %1205 = vmatpush2.msra.mxu1 %v945_v35  ;;  %v917_v33 = vld [vmem:[%s2698_s3 + $0x710] sm:$0xff]  ;;  %v852_v34 = vld [vmem:[%s2698_s3 + $0x508] sm:$0xff] }
 0x124   : > { %1131 = vmatprep.subr.mxu0 %v880_v36  ;;  %1206 = vmatprep.subr.mxu1 %v944_v37  ;;  %v916_v35 = vld [vmem:[%s2698_s3 + $0x708] sm:$0xff]  ;;  %v611_v36 = vpop.f32.mrf.mxu0  ;;  %v688_v37 = vpop.f32.mrf.mxu1 }
 0x125   : > { %1132 = vmatpush2.msra.mxu0 %v879_v40  ;;  %1207 = vmatpush2.msra.mxu1 %v943_v41  ;;  %v851_v40 = vld [vmem:[%s2698_s3 + $0x500] sm:$0xff] }
 0x126   : > { %1133 = vmatprep.subr.mxu0 %v878_v42  ;;  %1208 = vmatprep.subr.mxu1 %v942_v43  ;;  %v915_v41 = vld [vmem:[%s2698_s3 + $0x700] sm:$0xff]  ;;  %v604_v42 = vadd.f32 %v2299_v38, %v2251_v10  ;;  %v681_v43 = vadd.f32 %v2301_v39, %v2251_v10 }
 0x127   : > { %1134 = vmatpush2.msra.mxu0 %v877_v44  ;;  %1209 = vmatpush2.msra.mxu1 %v941_v45  ;;  %v612_v44 = vadd.f32 %v611_v36, %v2275_v25  ;;  %v689_v45 = vadd.f32 %v688_v37, %v2275_v25  ;;  %v1247_v36 = vld [vmem:[%s2699_s4] sm:$0x1] }
 0x128   : > { %1135 = vmatprep.subr.mxu0 %v876_v46  ;;  %1210 = vmatprep.subr.mxu1 %v940_v47  ;;  %v610_v46 = vadd.f32 %v609_v26, %v2275_v25  ;;  %v687_v47 = vadd.f32 %v686_v27, %v2275_v25 }
 0x129   : > { %1136 = vmatpush2.msra.mxu0 %v875_v48  ;;  %1211 = vmatpush2.msra.mxu1 %v939_v49 }
 0x12a   : > { %1137 = vmatprep.subr.mxu0 %v874_v50  ;;  %1212 = vmatprep.subr.mxu1 %v938_v51 }
 0x12b   : > { %1138 = vmatpush2.msra.mxu0 %v873_v52  ;;  %1213 = vmatpush2.msra.mxu1 %v937_v53  ;;  %v1624_v52 = vmov 1966171168  }
 0x12c   : > { %1139 = vmatprep.subr.mxu0 %v872_v54  ;;  %1214 = vmatprep.subr.mxu1 %v936_v55  ;;  %v1251_v53 = vunpack.c.l.s4 %v1624_v52  ;;  %v1253_v54 = vlaneseq }
 0x12d   : > { %1140 = vmatpush2.msra.mxu0 %v871_v56  ;;  %1215 = vmatpush2.msra.mxu1 %v935_v57 }
 0x12e   : > { %1141 = vmatprep.subr.mxu0 %v870_v58  ;;  %1216 = vmatprep.subr.mxu1 %v934_v59  ;;  %v1252_v55 = vunpack.c.0.s8 %v1251_v53  ;;  %v1254_v56 = vshrl.u32 %v1253_v54, 7 }
 0x12f   : > { %1142 = vmatpush2.msra.mxu0 %v869_v60  ;;  %1217 = vmatpush2.msra.mxu1 %v933_v61 }
 0x130   : > { %1143 = vmatprep.subr.mxu0 %v868_v62  ;;  %1218 = vmatprep.subr.mxu1 %v932_v63  ;;  %v1255_v25 = vsub.s32 %v1252_v55, %v1254_v56 }
 0x131   : > { %1144 = vmatpush2.msra.mxu0 %v867_v0  ;;  %1219 = vmatpush2.msra.mxu1 %v931_v1 }
 0x132   : > { %1145 = vmatprep.subr.mxu0 %v866_v2  ;;  %1220 = vmatprep.subr.mxu1 %v930_v3 }
 0x133   : > { %1146 = vmatpush2.msra.mxu0 %v865_v4  ;;  %1221 = vmatpush2.msra.mxu1 %v929_v5 }
 0x134   : > { %1147 = vmatprep.subr.mxu0 %v864_v6  ;;  %1222 = vmatprep.subr.mxu1 %v928_v7 }
 0x135   : > { %1148 = vmatpush2.msra.mxu0 %v863_v8  ;;  %1223 = vmatpush2.msra.mxu1 %v927_v9 }
 0x136   : > { %1149 = vmatprep.subr.mxu0 %v862_v11  ;;  %1224 = vmatprep.subr.mxu1 %v926_v12 }
 0x137   : > { %1150 = vmatpush2.msra.mxu0 %v861_v13  ;;  %1225 = vmatpush2.msra.mxu1 %v925_v14 }
 0x138   : > { %1151 = vmatprep.subr.mxu0 %v860_v15  ;;  %1226 = vmatprep.subr.mxu1 %v924_v16 }
 0x139   : > { %1152 = vmatpush2.msra.mxu0 %v859_v17  ;;  %1227 = vmatpush2.msra.mxu1 %v923_v18 }
 0x13a   : > { %1153 = vmatprep.subr.mxu0 %v858_v19  ;;  %1228 = vmatprep.subr.mxu1 %v922_v20 }
 0x13b   : > { %1154 = vmatpush2.msra.mxu0 %v857_v21  ;;  %1229 = vmatpush2.msra.mxu1 %v921_v22 }
 0x13c   : > { %1155 = vmatprep.subr.mxu0 %v856_v23  ;;  %1230 = vmatprep.subr.mxu1 %v920_v24 }
 0x13d   : > { %1156 = vmatpush2.msra.mxu0 %v855_v28  ;;  %1231 = vmatpush2.msra.mxu1 %v919_v29 }
 0x13e   : > { %1157 = vmatprep.subr.mxu0 %v854_v30  ;;  %1232 = vmatprep.subr.mxu1 %v918_v31 }
 0x13f   : > { %1158 = vmatpush2.msra.mxu0 %v853_v32  ;;  %1233 = vmatpush2.msra.mxu1 %v917_v33 }
 0x140   : > { %1159 = vmatprep.subr.mxu0 %v852_v34  ;;  %1234 = vmatprep.subr.mxu1 %v916_v35 }
 0x141   : > { %1160 = vmatpush2.msra.mxu0 %v851_v40  ;;  %1235 = vmatpush2.msra.mxu1 %v915_v41 }
 0x142   : > { %1162 = vmatmul.mubr.f32.vlgmr.msra.gmra.mxu0 %v604_v42  ;;  %1237 = vmatmul.mubr.f32.vlgmr.msra.gmra.mxu1 %v681_v43 }
 0x143   : > { %1166 = vmatprep.mubr.f32.mxu0 %v612_v44  ;;  %1241 = vmatprep.mubr.f32.mxu1 %v689_v45 }
 0x146   : > { %1167 = vmatmul.mubr.f32.gmra.mxu0 %v610_v46  ;;  %1242 = vmatmul.mubr.f32.gmra.mxu1 %v687_v47 }
 0x1bf   : > { %v1013_v38 = vpop.f32.mrf.mxu0  ;;  %v1088_v10 = vpop.f32.mrf.mxu1 }
 0x1c0   : > { %v1089_v39 = vadd.f32 %v1088_v10, %v1013_v38 }
 0x1c1   : > { %v1015_v48 = vpop.f32.mrf.mxu0  ;;  %v1090_v49 = vpop.f32.mrf.mxu1 }
 0x1c5   : > { %v1018_v50 = vpop.f32.mrf.mxu0  ;;  %v1093_v51 = vpop.f32.mrf.mxu1 }
 0x1c7   : > { %v1019_v57 = vpop.f32.mrf.mxu0  ;;  %v1094_v58 = vpop.f32.mrf.mxu1 }
 0x1c8   : > { %v1095_v3 = vadd.f32 %v1094_v58, %v1019_v57 }
 0x202   : > { %v1163_v59 = vpop.f32.mrf.mxu0  ;;  %v1238_v60 = vpop.f32.mrf.mxu1 }
 0x203   : > { %v1164_v61 = vadd.f32 %v1163_v59, %v1089_v39 }
 0x204   : > { %v1165_v62 = vpop.f32.mrf.mxu0  ;;  %v1240_v63 = vpop.f32.mrf.mxu1 }
 0x205   : > { %v1239_v0 = vadd.f32 %v1238_v60, %v1164_v61 }
 0x206   : > { %v1168_v1 = vpop.f32.mrf.mxu0  ;;  %v1243_v2 = vpop.f32.mrf.mxu1 }
 0x207   : > { %v1256_v4 = vrot.slane %v1239_v0, %v1255_v25  ;;  %v1286_v5 = vcombine.high %v1239_v0, %v1239_v0  ;;  %v1248_v40 = vadd.f32 %v1247_v36, %v1239_v0 }
 0x208   : > { %v1169_v6 = vpop.f32.mrf.mxu0  ;;  %v1244_v13 = vpop.f32.mrf.mxu1 }
 0x209   : > { %v1293_v7 = vrot.slane %v1286_v5, %v1255_v25  ;;  %v1170_v8 = vadd.f32 %v1169_v6, %v1095_v3  ;;  %v1257_v9 = vcombine.high %v1256_v4, %v1256_v4  ;;  %v1264_v12 = vrot.slane %v1256_v4, %v1255_v25 }
 0x20b   : > { %v1271_v11 = vrot.slane %v1257_v9, %v1255_v25  ;;  %v1245_v14 = vadd.f32 %v1244_v13, %v1170_v8  ;;  %v1305_v16 = vcombine.high %v1293_v7, %v1293_v7  ;;  %v1276_v17 = vcombine.high %v1264_v12, %v1264_v12 }
 0x20c   : > { %v1300_v20 = vrot.slane %v1293_v7, %v1255_v25 }
 0x20d   : > { %1272 = vrot.lane.b32.xlu1 %v1271_v11, %s1625_s9  ;;  %v1281_v15 = vcombine.high %v1271_v11, %v1271_v11  ;;  %v1335_v18 = vrot.slane %v1245_v14, %v1255_v25  ;;  %v1312_v19 = vrot.slane %v1305_v16, %v1255_v25  ;;  %v1365_v21 = vcombine.high %v1245_v14, %v1245_v14 }
 0x20e   : > { %v1317_v24 = vcombine.high %v1300_v20, %v1300_v20 }
 0x20f   : > { %1282 = vrot.lane.b32.xlu0 %v1281_v15, %s1626_s10  ;;  %v1322_v22 = vcombine.high %v1312_v19, %v1312_v19  ;;  %v1343_v23 = vrot.slane %v1335_v18, %v1255_v25  ;;  %v1336_v26 = vcombine.high %v1335_v18, %v1335_v18  ;;  %v1372_v28 = vrot.slane %v1365_v21, %v1255_v25 }
 0x211   : > { %1277 = vrot.lane.b32.xlu1 %v1276_v17, %s1627_s11  ;;  %v1355_v27 = vcombine.high %v1343_v23, %v1343_v23  ;;  %v1350_v29 = vrot.slane %v1336_v26, %v1255_v25  ;;  %v1379_v30 = vrot.slane %v1372_v28, %v1255_v25  ;;  %v1384_v32 = vcombine.high %v1372_v28, %v1372_v28 }
 0x213   : > { %1313 = vrot.lane.b32.xlu0 %v1312_v19, %s1628_s13  ;;  %v1360_v31 = vcombine.high %v1350_v29, %v1350_v29  ;;  %v1396_v33 = vcombine.high %v1379_v30, %v1379_v30  ;;  %v1391_v34 = vrot.slane %v1384_v32, %v1255_v25 }
 0x215   : > { %1301 = vrot.lane.b32.xlu1 %v1300_v20, %s1629_s14  ;;  %v1401_v35 = vcombine.high %v1391_v34, %v1391_v34 }
 0x217   : > { %1323 = vrot.lane.b32.xlu0 %v1322_v22, %s1630_s15 }
 0x219   : > { %1318 = vrot.lane.b32.xlu1 %v1317_v24, %s1631_s16 }
 0x21b   : > { %1356 = vrot.lane.b32.xlu0 %v1355_v27, %s1627_s11  ;;  %s1632_s11 = smov [#allocation3]  }
 0x21c   : > { %s1564_s22 = sshll.u32 %s1632_s11, 4  ;;  %s1565_s22 = int_to_ptr.vmem [resolvable:$false] %s1564_s22 }
 0x21d   : > { %1351 = vrot.lane.b32.xlu1 %v1350_v29, %s1625_s9  ;;  %s1409_s9 = scalar_lea.sflag [#allocation4], %s1788_s12  ;;  %p1567_p2 = scmp.lt.s32.totalorder %s1422_s30, %s1565_s22 }
 0x21f   : > { %1380 = vrot.lane.b32.xlu0 %v1379_v30, %s1629_s14 }
 0x221   : > { %1361 = vrot.lane.b32.xlu1 %v1360_v31, %s1626_s10  ;;  %s1560_s10 = scalar_lea.vmem %s1422_s30, 16 }
 0x222   : > { %p1561_p13 = scmp.ne.s32.totalorder %s1422_s30, %s1560_s10 }
 0x223   : > { %1397 = vrot.lane.b32.xlu0 %v1396_v33, %s1631_s16 }
 0x224   : > { %p1562_p0 = pnand %p1561_p13, %p1701_p6 }
 0x225   : > { %1392 = vrot.lane.b32.xlu1 %v1391_v34, %s1628_s13  ;;  %s1566_s13 = scalar_lea.vmem %s1565_s22, 32 }
 0x226   : > { %p1563_p1 = pneg %p1562_p0  ;;  %p1568_p3 = scmp.lt.s32.totalorder %s1566_s13, %s1560_s10 }
 0x228   : > { %p1569_p4 = por %p1568_p3, %p1567_p2 }
 0x229   : > { %1402 = vrot.lane.b32.xlu1 %v1401_v35, %s1630_s15 }
 0x22a   : > { %p1570_p5 = pnand %p1569_p4, %p1563_p1 }
 0x27f   : > { %v1273_v37 = vpop.permute.xlu1 %1272 }
 0x280   : > { %v1275_v42 = vadd.f32 %v1273_v37, %v1248_v40 }
 0x281   : > { %v1283_v41 = vpop.permute.xlu0 %1282 }
 0x283   : > { %v1278_v43 = vpop.permute.xlu1 %1277 }
 0x284   : > { %v1280_v44 = vadd.f32 %v1278_v43, %v1275_v42 }
 0x285   : > { %v1314_v45 = vpop.permute.xlu0 %1313 }
 0x286   : > { %v1285_v46 = vadd.f32 %v1283_v41, %v1280_v44 }
 0x287   : > { %v1302_v47 = vpop.permute.xlu1 %1301 }
 0x288   : > { %v1304_v38 = vadd.f32 %v1302_v47, %v1285_v46 }
 0x289   : > { %v1324_v10 = vpop.permute.xlu0 %1323 }
 0x28a   : > { %v1316_v39 = vadd.f32 %v1314_v45, %v1304_v38 }
 0x28b   : > { %v1319_v48 = vpop.permute.xlu1 %1318 }
 0x28c   : > { %v1321_v49 = vadd.f32 %v1319_v48, %v1316_v39 }
 0x28d   : > { %v1357_v51 = vpop.permute.xlu0 %1356 }
 0x28e   : > { %v1326_v50 = vadd.f32 %v1324_v10, %v1321_v49 }
 0x28f   : > { %v1352_v52 = vpop.permute.xlu1 %1351 }
 0x290   : > { %v1327_v53 = vadd.f32 %v1326_v50, %v1245_v14 }
 0x291   : > { %v1381_v57 = vpop.permute.xlu0 %1380 }
 0x292   : > { %v1354_v54 = vadd.f32 %v1352_v52, %v1327_v53 }
 0x293   : > { %v1362_v55 = vpop.permute.xlu1 %1361 }
 0x294   : > { %v1359_v56 = vadd.f32 %v1357_v51, %v1354_v54 }
 0x295   : > { %v1398_v25 = vpop.permute.xlu0 %1397 }
 0x296   : > { %v1364_v58 = vadd.f32 %v1362_v55, %v1359_v56 }
 0x297   : > { %v1393_v59 = vpop.permute.xlu1 %1392 }
 0x298   : > { %v1383_v60 = vadd.f32 %v1381_v57, %v1364_v58 }
 0x29a   : > { %v1395_v61 = vadd.f32 %v1393_v59, %v1383_v60 }
 0x29b   : > { %v1403_v63 = vpop.permute.xlu1 %1402 }
 0x29c   : > { %v1400_v62 = vadd.f32 %v1398_v25, %v1395_v61 }
 0x29e   : > { %v1405_v0 = vadd.f32 %v1403_v63, %v1400_v62 }
 0x2a0   : > { %1407 = vst.msk [vmem:[%s303_s26] sm:$0x1] %vm1406_vm2, %v1405_v0 }
 0x2a1   : > { %1573 = shalt.err (!%p1570_p5)
}
 0x2a2   : > { %s1574_s14 = scalar_lea.hbm %s1419_s8, 16  ;;  %s1578_s16 = scalar_lea.hbm %s2700_s5, 32 }
 0x2a3   : > { %p1575_p7 = scmp.ne.s32.totalorder %s1419_s8, %s1574_s14  ;;  %p1579_p12 = scmp.lt.s32.totalorder %s1419_s8, %s2700_s5 }
 0x2a4   : > { %p1580_p13 = scmp.lt.s32.totalorder %s1578_s16, %s1574_s14 }
 0x2a5   : > { %p1576_p10 = pnand %p1575_p7, %p1701_p6 }
 0x2a6   : > { %p1581_p0 = por %p1580_p13, %p1579_p12 }
 0x2a7   : > { %p1577_p11 = pneg %p1576_p10 }
 0x2a9   : > { %p1582_p9 = pnand %p1581_p0, %p1577_p11 }
 0x2ab   : > { %1585 = shalt.err (!%p1582_p9)
}
 0x2ac   : > { %1510 = dma.vmem_to_hbm [thread:$0]  (%p1701_p6), %s1422_s30, 16, %s1419_s8, %s1409_s9  }
 0x2ad PF: > { %s1433_s25 = sand.u32 1, %s1608_s18   ;;  %p2704_p1 = scmp.ge.s32.totalorder %s1620_s21, 2 }
 0x2ae   : > { %s1434_s26 = scalar_lea.sflag [#allocation4], %s1433_s25 }
 0x2af   : > { %p1513_p2 = pnand %p2704_p1, %p1705_p8 }
 0x2b1   : > { %p1514_p3 = pneg %p1513_p2 }
 0x2b3   : > { %1603 = dma.done.wait (%p1514_p3), %s1434_s26, 16  }
 0x2b4   : > { %1605 = vsyncadd (%p1514_p3), %s1434_s26, 4294967280  ;;  %p15_p9 = scmp.ge.s32.totalorder %s1686_s24, 4   ;;  %s2705_s18 = smov %s1612_s19 }
 0x2b5   : > { %s2706_s19 = smov %s1616_s20  ;;  %s2707_s20 = smov %s1699_s27 }
 0x2b6   : > { %s2708_s21 = smov %s1686_s24  ;;  %17 = sbr.rel (!%p15_p9) target bundleno = 3 (0x3), region = 103 }
 0x2bb   :  { %1438 = vsyncpa [#allocation4], 1 }
 0x2bc   :  { %1440 = vsyncpa [#allocation4 + $0x1], 1 }

</bundles_post_ra>
